<compile_context>
chip_gen: v7x
topology: tpu7x:2x2x1
jax: 0.10.0
libtpu: 0.0.40
codegen_flags: <defaults>
</compile_context>

<pallas_src>
import functools

import jax
import jax.numpy as jnp
from jax.experimental import pallas as pl
from jax.experimental.pallas import tpu as pltpu

EPS = 1e-8


# --------------------------------------------------------------------------
# Kernel
# --------------------------------------------------------------------------
def _rmsnorm_kernel(x_ref, w_ref, b_ref, o_ref, *, eps):
    """RMSLayerNorm over one (rows, H) tile.

    x_ref: (rows, H)  activations (rows -> sublanes, H -> lanes)
    w_ref: (1, H)     scale
    b_ref: (1, H)     bias
    """
    x = x_ref[...].astype(jnp.float32)                      # keep VPU math in f32
    ms = jnp.mean(x * x, axis=-1, keepdims=True)            # (rows, 1)
    rms = jnp.sqrt(ms)
    inv = pl.reciprocal(rms + eps, approx=True)             # EUP slot (free-ish)
    y = w_ref[...].astype(jnp.float32) * (x * inv) + b_ref[...].astype(jnp.float32)
    o_ref[...] = y.astype(o_ref.dtype)


# --------------------------------------------------------------------------
# Wrapper
# --------------------------------------------------------------------------
def rms_layer_norm(x, weight, bias, *, eps=EPS, block_rows=512):
    """Apply RMSLayerNorm over the last dim of `x` (any leading shape)."""
    H = x.shape[-1]
    lead = x.shape[:-1]
    xf = x.reshape(-1, H)                                    # collapse batch/seq
    N = xf.shape[0]

    if N <= block_rows:
        # single full-extent block: no (8,128) divisibility constraint applies
        br = N
        n_pad = N
    else:
        br = block_rows                                      # multiple of 8
        n_pad = pl.cdiv(N, br) * br
        if n_pad != N:
            xf = jnp.pad(xf, ((0, n_pad - N), (0, 0)))       # pad rows; sliced off later

    w2 = weight.reshape(1, H)
    b2 = bias.reshape(1, H)

    out = pl.pallas_call(
        functools.partial(_rmsnorm_kernel, eps=eps),
        out_shape=jax.ShapeDtypeStruct((n_pad, H), x.dtype),
        grid=(n_pad // br,),
        in_specs=[
            pl.BlockSpec((br, H), lambda i: (i, 0)),
            pl.BlockSpec((1, H), lambda i: (0, 0)),
            pl.BlockSpec((1, H), lambda i: (0, 0)),
        ],
        out_specs=pl.BlockSpec((br, H), lambda i: (i, 0)),
        compiler_params=pltpu.CompilerParams(
            dimension_semantics=("parallel",)),              # megacore shard on v7x
    )(xf, w2, b2)

    if n_pad != N:
        out = out[:N]
    return out.reshape(*lead, H)


# --------------------------------------------------------------------------
# Pure-JAX reference (mirrors PyTorch semantics exactly)
# --------------------------------------------------------------------------
def ref_rms_layer_norm(x, weight, bias, eps=EPS):
    xf = x.astype(jnp.float32)
    rms = jnp.sqrt(jnp.mean(xf * xf, axis=-1, keepdims=True))
    return (weight * (xf / (rms + eps)) + bias).astype(x.dtype)


# --------------------------------------------------------------------------
# Main
# --------------------------------------------------------------------------
if __name__ == "__main__":
    B, S, H = 4, 256, 128                                    # hidden_size=128 (model cfg)

    key = jax.random.PRNGKey(0)
    kx, kw, kb = jax.random.split(key, 3)
    x = jax.random.normal(kx, (B, S, H), dtype=jnp.float32)
    # module initializes weight=1, bias=0; use random affine params so the
    # scale/shift path is actually exercised by the check.
    weight = 1.0 + 0.1 * jax.random.normal(kw, (H,), dtype=jnp.float32)
    bias = 0.1 * jax.random.normal(kb, (H,), dtype=jnp.float32)

    out = rms_layer_norm(x, weight, bias)
    out = jax.block_until_ready(out)

    assert out.shape == (B, S, H), out.shape
    assert bool(jnp.all(jnp.isfinite(out)))

    ref = ref_rms_layer_norm(x, weight, bias)
    rel_err = float(jnp.max(jnp.abs(out - ref)) / (jnp.max(jnp.abs(ref)) + 1e-6))
    assert rel_err < 1e-2, f"relative error too large: {rel_err}"

    print("KERNEL_OK")
</pallas_src>

<mosaic_0001>
module attributes {stable_mosaic.version = 11 : i64} {
  func.func @_rmsnorm_kernel(%arg0: i32, %arg1: memref<512x128xf32, #tpu.memory_space<vmem>>, %arg2: memref<1x128xf32, #tpu.memory_space<vmem>>, %arg3: memref<1x128xf32, #tpu.memory_space<vmem>>, %arg4: memref<512x128xf32, #tpu.memory_space<vmem>>) attributes {dimension_semantics = [#tpu.dimension_semantics<parallel>], iteration_bounds = array<i64: 2>, scalar_prefetch = 0 : i64, scratch_operands = 0 : i64, tpu.core_type = #tpu.core_type<tc>, window_params = [{transform_indices = @transform_0, window_bounds = array<i64: 512, 128>}, {pipeline_mode = #tpu.pipeline_mode<synchronous>, transform_indices = @transform_1, window_bounds = array<i64: 1, 128>}, {pipeline_mode = #tpu.pipeline_mode<synchronous>, transform_indices = @transform_2, window_bounds = array<i64: 1, 128>}, {transform_indices = @transform_3, window_bounds = array<i64: 512, 128>}]} {
    %c0 = arith.constant 0 : index
    %c0_0 = arith.constant 0 : index
    %0 = vector.load %arg1[%c0, %c0_0] : memref<512x128xf32, #tpu.memory_space<vmem>>, vector<512x128xf32>
    %1 = arith.mulf %0, %0 : vector<512x128xf32>
    %cst = arith.constant dense<0.000000e+00> : vector<512xf32>
    %2 = vector.multi_reduction <add>, %1, %cst [1] : vector<512x128xf32> to vector<512xf32>
    %3 = vector.shape_cast %2 : vector<512xf32> to vector<512x1xf32>
    %cst_1 = arith.constant 1.280000e+02 : f32
    %4 = vector.broadcast %cst_1 : f32 to vector<512x1xf32>
    %5 = arith.divf %3, %4 : vector<512x1xf32>
    %6 = math.sqrt %5 : vector<512x1xf32>
    %cst_2 = arith.constant 9.99999993E-9 : f32
    %7 = vector.broadcast %cst_2 : f32 to vector<512x1xf32>
    %8 = arith.addf %6, %7 : vector<512x1xf32>
    %9 = tpu.reciprocal %8 {approx = true} : vector<512x1xf32> -> vector<512x1xf32>
    %c0_3 = arith.constant 0 : index
    %c0_4 = arith.constant 0 : index
    %10 = vector.load %arg2[%c0_3, %c0_4] : memref<1x128xf32, #tpu.memory_space<vmem>>, vector<1x128xf32>
    %11 = vector.broadcast %9 : vector<512x1xf32> to vector<512x128xf32>
    %12 = arith.mulf %0, %11 : vector<512x128xf32>
    %13 = vector.broadcast %10 : vector<1x128xf32> to vector<512x128xf32>
    %14 = arith.mulf %13, %12 : vector<512x128xf32>
    %c0_5 = arith.constant 0 : index
    %c0_6 = arith.constant 0 : index
    %15 = vector.load %arg3[%c0_5, %c0_6] : memref<1x128xf32, #tpu.memory_space<vmem>>, vector<1x128xf32>
    %16 = vector.broadcast %15 : vector<1x128xf32> to vector<512x128xf32>
    %17 = arith.addf %14, %16 : vector<512x128xf32>
    %c0_7 = arith.constant 0 : index
    %c0_8 = arith.constant 0 : index
    %18 = vector.load %arg4[%c0_7, %c0_8] : memref<512x128xf32, #tpu.memory_space<vmem>>, vector<512x128xf32>
    tpu.vector_store %arg4[%c0_7, %c0_8], %17 {strides = array<i32>} : memref<512x128xf32, #tpu.memory_space<vmem>>, vector<512x128xf32>,
    return
  }
  func.func @transform_0(%arg0: i32) -> (i32, i32) {
    %c0_i32 = arith.constant 0 : i32
    %c0_i32_0 = arith.constant 0 : i32
    return %arg0, %c0_i32 : i32, i32
  }
  func.func @transform_1(%arg0: i32) -> (i32, i32) {
    %c0_i32 = arith.constant 0 : i32
    %c0_i32_0 = arith.constant 0 : i32
    %c0_i32_1 = arith.constant 0 : i32
    return %c0_i32, %c0_i32_0 : i32, i32
  }
  func.func @transform_2(%arg0: i32) -> (i32, i32) {
    %c0_i32 = arith.constant 0 : i32
    %c0_i32_0 = arith.constant 0 : i32
    %c0_i32_1 = arith.constant 0 : i32
    return %c0_i32, %c0_i32_0 : i32, i32
  }
  func.func @transform_3(%arg0: i32) -> (i32, i32) {
    %c0_i32 = arith.constant 0 : i32
    %c0_i32_0 = arith.constant 0 : i32
    return %arg0, %c0_i32 : i32, i32
  }
}

</mosaic_0001>

<bundles_post_ra>
// kernel: tpu_custom_call.1
= control target key start
LH: loop header
LB: loop body
LE: loop exit
PB: predicated region body
PF: predicated region fallthrough
CT: control target
= control target key end

     0   :  { %8 = vsyncpa [#allocation3], 0  ;;  %s3205_s0 = inlined_call_operand.hbm [shape: f32[1024,128], index: 0, kind: input, shape index: {}]   ;;  %s3206_s1 = inlined_call_operand.vmem [shape: f32[1,128], index: 1, kind: input, shape index: {}]   ;;  %s3207_s2 = inlined_call_operand.vmem [shape: f32[1,128], index: 2, kind: input, shape index: {}]   ;;  %s3208_s3 = inlined_call_operand.hbm [shape: f32[1024,128], index: 3, kind: output, shape index: {}]  }
   0x1   :  { %10 = vsyncpa [#allocation3 + $0x1], 0 }
   0x2   :  { %11 = vsyncpa [#allocation4], 0 }
   0x3   :  { %13 = vsyncpa [#allocation4 + $0x1], 0  ;;  %s1942_s12 = smov 0   ;;  %s1944_s13 = smov 0  }
   0x4   :  { %s1946_s14 = smov 0   ;;  %s1948_s15 = smov 0  }
   0x5 LB: > { %s1963_s16 = sadd.s32 4294967295, %s1914_s15   ;;  %s1445_s17 = sadd.s32 4294967294, %s1914_s15   ;;  %s1914_s15 = sphi %s1948_s15, %s3221_s15   ;;  %s1910_s14 = sphi %s1946_s14, %s3220_s14   ;;  %s1906_s13 = sphi %s1944_s13, %s3219_s13   ;;  %s1902_s12 = sphi %s1942_s12, %s3218_s12  }
   0x6   : > { %s1967_s18 = sadd.s32 1, %s1914_s15   ;;  %s26_s19 = sadd.s32 1, %s1910_s14 }
   0x7   : > { %s23_s20 = ssub.s32 %s1914_s15, %s1967_s18  ;;  %p33_p0 = scmp.ne.s32.totalorder %s1910_s14, %s1906_s13 }
   0x8   : > { %p24_p1 = scmp.eq.s32.totalorder %s23_s20, 0  ;;  %p34_p2 = scmp.eq.s32.totalorder %s1914_s15, 0 }
   0x9   : > { %p39_p3 = scmp.ne.s32.totalorder %s1906_s13, %s1902_s12  ;;  %p40_p4 = scmp.eq.s32.totalorder %s1963_s16, 0 }
   0xa   : > { %s1979_s21 = scalar_select %p24_p1, %s1910_s14, %s26_s19  }
   0xb   : > { %p1981_p5 = por %p34_p2, %p33_p0  ;;  %p1985_p6 = por %p40_p4, %p39_p3 }
   0xc   : > { %p105_p7 = scmp.eq.s32.totalorder %s1963_s16, 1  ;;  %p111_p8 = scmp.eq.s32.totalorder %s1445_s17, 1 }
   0xd   : > { %p1475_p10 = scmp.lt.s32.totalorder %s1914_s15, 2  ;;  %s137_s26 = sand.u32 1, %s1910_s14  }
   0xe   : > { %p1992_p11 = por %p105_p7, %p33_p0  ;;  %p1996_p12 = por %p111_p8, %p39_p3 }
   0xf   : > { %s1461_s27 = sshll.u32 %s1914_s15, 13  ;;  %s1448_s28 = sshll.u32 %s137_s26, 9 }
  0x10   : > { %s3212_s24 = scalar_select %p1992_p11, 1, 0 }
  0x11   : > { %s3213_s25 = scalar_select %p1996_p12, 1, 0 }
  0x12   : > { %s2005_s4 = scalar_lea.hbm %s3205_s0, %s1461_s27  ;;  %s141_s5 = scalar_lea.vmem [#allocation2], %s1448_s28 }
  0x13   : > { %s148_s6 = sshll.u32 %s141_s5, 4  ;;  %p2009_p13 = pnand %p1475_p10, %p1981_p5  ;;  %s2013_s6 = int_to_ptr.vmem [resolvable:$true] %s148_s6 }
  0x14   : > { %s2015_s8 = scalar_lea.sflag [#allocation3], %s137_s26  ;;  %s1818_s9 = scalar_lea.hbm %s2005_s4, 8192 }
  0x15   : > { %p1819_p0 = scmp.ne.s32.totalorder %s2005_s4, %s1818_s9  ;;  %p1820_p1 = pneg %p2009_p13 }
  0x16   : > { %s1823_s17 = scalar_lea.hbm %s3205_s0, 16384  ;;  %p1824_p4 = scmp.lt.u32.totalorder %s2005_s4, %s3205_s0 }
  0x17   : > { %p1821_p2 = pnand %p1820_p1, %p1819_p0  ;;  %p1825_p5 = scmp.lt.u32.totalorder %s1823_s17, %s1818_s9 }
  0x18   : > { %p1827_p8 = scmp.lt.u32.totalorder %s1818_s9, %s2005_s4 }
  0x19   : > { %p1822_p3 = pneg %p1821_p2  ;;  %p1826_p7 = por %p1825_p5, %p1824_p4 }
  0x1b   : > { %p1828_p10 = por %p1827_p8, %p1826_p7 }
  0x1d   : > { %p1829_p9 = pnand %p1828_p10, %p1822_p3 }
  0x1f   : > { %1832 = shalt.err (!%p1829_p9)
}
  0x20   : > { %s1833_s22 = scalar_lea.vmem %s2013_s6, 8192  ;;  %s1916_s26 = smov [#allocation2]  }
  0x21   : > { %p1834_p0 = scmp.ne.s32.totalorder %s2013_s6, %s1833_s22  ;;  %s1838_s27 = sshll.u32 %s1916_s26, 4  ;;  %s1839_s27 = int_to_ptr.vmem [resolvable:$false] %s1838_s27 }
  0x22   : > { %s1840_s28 = scalar_lea.vmem %s1839_s27, 16384  ;;  %p1841_p11 = scmp.lt.s32.totalorder %s2013_s6, %s1839_s27 }
  0x23   : > { %p1836_p2 = pnand %p1834_p0, %p1820_p1  ;;  %p1842_p4 = scmp.lt.s32.totalorder %s1840_s28, %s1833_s22 }
  0x25   : > { %p1837_p12 = pneg %p1836_p2  ;;  %p1843_p5 = por %p1842_p4, %p1841_p11 }
  0x27   : > { %p1844_p7 = pnand %p1843_p5, %p1837_p12 }
  0x29   : > { %1847 = shalt.err (!%p1844_p7)
}
  0x2a   : > { %s1917_s29 = smov 128   ;;  %s1918_s30 = smov 8  }
  0x2b   : > { %1470 = dma.hbm_to_vmem [thread:$0]  (!%p2009_p13), %s2005_s4, 8192, %s2013_s6, %s2015_s8, %s1917_s29, %s1917_s29, %s1918_s30  }
  0x2c   : > { %p1451_p9 = scmp.ge.s32.totalorder %s1914_s15, 1  ;;  %p156_p1 = scmp.lt.s32.totalorder %s1914_s15, 3 }
  0x2e   : > { %p157_p3 = pnand %p1451_p9, %p156_p1 }
  0x2f   : > { %s2046_s5 = sand.u32 (!%p157_p3), 1, %s1906_s13  }
  0x30   : > { %160 = sbr.rel (%p157_p3) target bundleno = 447 (0x1bf), region = 32  ;;  %s1452_s9 = sshll.u32 (!%p157_p3), %s2046_s5, 9 }
  0x31   : > { %s163_s10 = scalar_lea.sflag (!%p157_p3), [#allocation3], %s2046_s5  ;;  %s2052_s11 = scalar_lea.vmem (!%p157_p3), [#allocation2], %s1452_s9 }
  0x37   : > { %1893 = dma.done.wait (%p1985_p6), %s163_s10, 8192  }
  0x38   : > { %1895 = vsyncadd (%p1985_p6), %s163_s10, 4294959104  ;;  %v2059_v0 = vld [vmem:[%s2052_s11 + $0x10] sm:$0xff]  ;;  %v2062_v1 = vld [vmem:[%s2052_s11] sm:$0xff]  ;;  %s2312_s8 = scalar_lea.vmem [#allocation5], %s1452_s9  ;;  %s1462_s26 = sshll.u32 %s1963_s16, 13 }
  0x39   : > { %v2065_v2 = vld [vmem:[%s2052_s11 + $0x18] sm:$0xff]  ;;  %v257_v3 = vmul.f32 %v2059_v0, %v2059_v0  ;;  %v255_v4 = vmul.f32 %v2062_v1, %v2062_v1  ;;  %v2072_v5 = vld [vmem:[%s2052_s11 + $0x8] sm:$0xff]  ;;  %v2082_v9 = vld [vmem:[%s2052_s11 + $0x20] sm:$0xff]  ;;  %s1372_s27 = sshll.u32 %s2312_s8, 4  ;;  %s3156_s30 = scalar_lea.hbm %s3208_s3, %s1462_s26  ;;  %s3158_s27 = int_to_ptr.vmem [resolvable:$true] %s1372_s27 }
  0x3a   : > { %v258_v6 = vmul.f32 %v2065_v2, %v2065_v2  ;;  %v256_v7 = vmul.f32 %v2072_v5, %v2072_v5  ;;  %v2079_v8 = vld [vmem:[%s2052_s11 + $0x28] sm:$0xff]  ;;  %v259_v11 = vmul.f32 %v2082_v9, %v2082_v9  ;;  %v2089_v12 = vld [vmem:[%s2052_s11 + $0x38] sm:$0xff]  ;;  %v2092_v13 = vld [vmem:[%s2052_s11 + $0x30] sm:$0xff]  ;;  %s1359_s16 = scalar_lea.sflag [#allocation4], %s2046_s5  ;;  %s1848_s9 = scalar_lea.vmem %s3158_s27, 8192 }
  0x3b   : > { %323 = vadd.xlane.f32.xlu1 %v257_v3  ;;  %319 = vadd.xlane.f32.xlu0 %v255_v4  ;;  %v260_v10 = vmul.f32 %v2079_v8, %v2079_v8  ;;  %v262_v14 = vmul.f32 %v2089_v12, %v2089_v12  ;;  %v261_v15 = vmul.f32 %v2092_v13, %v2092_v13  ;;  %v2099_v16 = vld [vmem:[%s2052_s11 + $0x48] sm:$0xff]  ;;  %v2102_v17 = vld [vmem:[%s2052_s11 + $0x40] sm:$0xff]  ;;  %v2109_v20 = vld [vmem:[%s2052_s11 + $0x58] sm:$0xff]  ;;  %p1849_p6 = scmp.ne.s32.totalorder %s3158_s27, %s1848_s9  ;;  %p3215_p11 = scmp.ne.s32.totalorder %s3212_s24, 0 }
  0x3c   : > { %v264_v18 = vmul.f32 %v2099_v16, %v2099_v16  ;;  %v263_v19 = vmul.f32 %v2102_v17, %v2102_v17  ;;  %v2112_v21 = vld [vmem:[%s2052_s11 + $0x50] sm:$0xff]  ;;  %v266_v22 = vmul.f32 %v2109_v20, %v2109_v20  ;;  %v2119_v24 = vld [vmem:[%s2052_s11 + $0x68] sm:$0xff]  ;;  %v2122_v25 = vld [vmem:[%s2052_s11 + $0x60] sm:$0xff]  ;;  %s1919_s10 = smov [#allocation5]  }
  0x3d   : > { %v265_v23 = vmul.f32 %v2112_v21, %v2112_v21  ;;  %v268_v26 = vmul.f32 %v2119_v24, %v2119_v24  ;;  %v267_v27 = vmul.f32 %v2122_v25, %v2122_v25  ;;  %v2129_v28 = vld [vmem:[%s2052_s11 + $0x78] sm:$0xff]  ;;  %v2132_v29 = vld [vmem:[%s2052_s11 + $0x70] sm:$0xff]  ;;  %v2139_v32 = vld [vmem:[%s2052_s11 + $0x88] sm:$0xff]  ;;  %p1850_p12 = pnand %p1849_p6, %p3215_p11 }
  0x3e   : > { %v270_v30 = vmul.f32 %v2129_v28, %v2129_v28  ;;  %v269_v31 = vmul.f32 %v2132_v29, %v2132_v29  ;;  %v207_v33 = vld [vmem:[%s2052_s11 + $0x80] sm:$0xff]  ;;  %v272_v34 = vmul.f32 %v2139_v32, %v2139_v32  ;;  %v210_v36 = vld [vmem:[%s2052_s11 + $0x98] sm:$0xff]  ;;  %v209_v37 = vld [vmem:[%s2052_s11 + $0x90] sm:$0xff] }
  0x3f   : > { %325 = vadd.xlane.f32.xlu1 %v258_v6  ;;  %321 = vadd.xlane.f32.xlu0 %v256_v7  ;;  %v271_v35 = vmul.f32 %v207_v33, %v207_v33  ;;  %v274_v38 = vmul.f32 %v210_v36, %v210_v36  ;;  %v273_v39 = vmul.f32 %v209_v37, %v209_v37  ;;  %v212_v40 = vld [vmem:[%s2052_s11 + $0xa8] sm:$0xff]  ;;  %v211_v41 = vld [vmem:[%s2052_s11 + $0xa0] sm:$0xff]  ;;  %v214_v44 = vld [vmem:[%s2052_s11 + $0xb8] sm:$0xff]  ;;  %p1851_p13 = pneg %p1850_p12 }
  0x40   : > { %v276_v42 = vmul.f32 %v212_v40, %v212_v40  ;;  %v275_v43 = vmul.f32 %v211_v41, %v211_v41  ;;  %v213_v45 = vld [vmem:[%s2052_s11 + $0xb0] sm:$0xff]  ;;  %v278_v46 = vmul.f32 %v214_v44, %v214_v44  ;;  %v216_v48 = vld [vmem:[%s2052_s11 + $0xc8] sm:$0xff]  ;;  %v215_v49 = vld [vmem:[%s2052_s11 + $0xc0] sm:$0xff] }
  0x41   : > { %v277_v47 = vmul.f32 %v213_v45, %v213_v45  ;;  %v280_v50 = vmul.f32 %v216_v48, %v216_v48  ;;  %v279_v51 = vmul.f32 %v215_v49, %v215_v49  ;;  %v218_v52 = vld [vmem:[%s2052_s11 + $0xd8] sm:$0xff]  ;;  %v217_v53 = vld [vmem:[%s2052_s11 + $0xd0] sm:$0xff]  ;;  %v220_v56 = vld [vmem:[%s2052_s11 + $0xe8] sm:$0xff] }
  0x42   : > { %v282_v54 = vmul.f32 %v218_v52, %v218_v52  ;;  %v281_v55 = vmul.f32 %v217_v53, %v217_v53  ;;  %v219_v57 = vld [vmem:[%s2052_s11 + $0xe0] sm:$0xff]  ;;  %v284_v58 = vmul.f32 %v220_v56, %v220_v56  ;;  %v222_v60 = vld [vmem:[%s2052_s11 + $0xf8] sm:$0xff]  ;;  %v221_v61 = vld [vmem:[%s2052_s11 + $0xf0] sm:$0xff] }
  0x43   : > { %329 = vadd.xlane.f32.xlu1 %v260_v10  ;;  %327 = vadd.xlane.f32.xlu0 %v259_v11  ;;  %v283_v59 = vmul.f32 %v219_v57, %v219_v57  ;;  %v286_v62 = vmul.f32 %v222_v60, %v222_v60  ;;  %v285_v63 = vmul.f32 %v221_v61, %v221_v61  ;;  %v224_v3 = vld [vmem:[%s2052_s11 + $0x108] sm:$0xff]  ;;  %v223_v4 = vld [vmem:[%s2052_s11 + $0x100] sm:$0xff]  ;;  %v226_v10 = vld [vmem:[%s2052_s11 + $0x118] sm:$0xff] }
  0x44   : > { %v288_v6 = vmul.f32 %v224_v3, %v224_v3  ;;  %v287_v7 = vmul.f32 %v223_v4, %v223_v4  ;;  %v225_v11 = vld [vmem:[%s2052_s11 + $0x110] sm:$0xff]  ;;  %v232_v33 = vld [vmem:[%s2052_s11 + $0x148] sm:$0xff]  ;;  %v234_v37 = vld [vmem:[%s2052_s11 + $0x158] sm:$0xff] }
  0x45   : > { %v236_v41 = vld [vmem:[%s2052_s11 + $0x168] sm:$0xff]  ;;  %v238_v45 = vld [vmem:[%s2052_s11 + $0x178] sm:$0xff] }
  0x46   : > { %v240_v49 = vld [vmem:[%s2052_s11 + $0x188] sm:$0xff]  ;;  %v242_v53 = vld [vmem:[%s2052_s11 + $0x198] sm:$0xff] }
  0x47   : > { %333 = vadd.xlane.f32.xlu1 %v262_v14  ;;  %331 = vadd.xlane.f32.xlu0 %v261_v15  ;;  %v290_v14 = vmul.f32 %v226_v10, %v226_v10  ;;  %v289_v15 = vmul.f32 %v225_v11, %v225_v11  ;;  %v244_v57 = vld [vmem:[%s2052_s11 + $0x1a8] sm:$0xff]  ;;  %v246_v61 = vld [vmem:[%s2052_s11 + $0x1b8] sm:$0xff] }
  0x48   : > { %v248_v4 = vld [vmem:[%s2052_s11 + $0x1c8] sm:$0xff]  ;;  %v250_v11 = vld [vmem:[%s2052_s11 + $0x1d8] sm:$0xff] }
  0x4b   : > { %337 = vadd.xlane.f32.xlu1 %v264_v18  ;;  %335 = vadd.xlane.f32.xlu0 %v263_v19  ;;  %v228_v18 = vld [vmem:[%s2052_s11 + $0x128] sm:$0xff]  ;;  %v227_v19 = vld [vmem:[%s2052_s11 + $0x120] sm:$0xff] }
  0x4f   : > { %341 = vadd.xlane.f32.xlu1 %v266_v22  ;;  %339 = vadd.xlane.f32.xlu0 %v265_v23  ;;  %v292_v22 = vmul.f32 %v228_v18, %v228_v18  ;;  %v291_v23 = vmul.f32 %v227_v19, %v227_v19  ;;  %v252_v19 = vld [vmem:[%s2052_s11 + $0x1e8] sm:$0xff] }
  0x53   : > { %345 = vadd.xlane.f32.xlu1 %v268_v26  ;;  %343 = vadd.xlane.f32.xlu0 %v267_v27  ;;  %v230_v26 = vld [vmem:[%s2052_s11 + $0x138] sm:$0xff]  ;;  %v229_v27 = vld [vmem:[%s2052_s11 + $0x130] sm:$0xff] }
  0x57   : > { %349 = vadd.xlane.f32.xlu1 %v270_v30  ;;  %347 = vadd.xlane.f32.xlu0 %v269_v31  ;;  %v294_v30 = vmul.f32 %v230_v26, %v230_v26  ;;  %v293_v31 = vmul.f32 %v229_v27, %v229_v27  ;;  %v254_v27 = vld [vmem:[%s2052_s11 + $0x1f8] sm:$0xff] }
  0x5b   : > { %353 = vadd.xlane.f32.xlu1 %v272_v34  ;;  %351 = vadd.xlane.f32.xlu0 %v271_v35  ;;  %v231_v34 = vld [vmem:[%s2052_s11 + $0x140] sm:$0xff]  ;;  %v296_v35 = vmul.f32 %v232_v33, %v232_v33 }
  0x5c   : > { %v295_v36 = vmul.f32 %v231_v34, %v231_v34 }
  0x5f   : > { %357 = vadd.xlane.f32.xlu1 %v274_v38  ;;  %355 = vadd.xlane.f32.xlu0 %v273_v39  ;;  %v233_v38 = vld [vmem:[%s2052_s11 + $0x150] sm:$0xff]  ;;  %v298_v39 = vmul.f32 %v234_v37, %v234_v37 }
  0x60   : > { %v297_v40 = vmul.f32 %v233_v38, %v233_v38 }
  0x63   : > { %361 = vadd.xlane.f32.xlu1 %v276_v42  ;;  %359 = vadd.xlane.f32.xlu0 %v275_v43  ;;  %v235_v42 = vld [vmem:[%s2052_s11 + $0x160] sm:$0xff]  ;;  %v300_v43 = vmul.f32 %v236_v41, %v236_v41 }
  0x64   : > { %v299_v44 = vmul.f32 %v235_v42, %v235_v42 }
  0x67   : > { %365 = vadd.xlane.f32.xlu1 %v278_v46  ;;  %363 = vadd.xlane.f32.xlu0 %v277_v47  ;;  %v237_v46 = vld [vmem:[%s2052_s11 + $0x170] sm:$0xff]  ;;  %v302_v47 = vmul.f32 %v238_v45, %v238_v45 }
  0x68   : > { %v301_v48 = vmul.f32 %v237_v46, %v237_v46 }
  0x6b   : > { %369 = vadd.xlane.f32.xlu1 %v280_v50  ;;  %367 = vadd.xlane.f32.xlu0 %v279_v51  ;;  %v239_v50 = vld [vmem:[%s2052_s11 + $0x180] sm:$0xff]  ;;  %v304_v51 = vmul.f32 %v240_v49, %v240_v49 }
  0x6c   : > { %v303_v52 = vmul.f32 %v239_v50, %v239_v50 }
  0x6f   : > { %373 = vadd.xlane.f32.xlu1 %v282_v54  ;;  %371 = vadd.xlane.f32.xlu0 %v281_v55  ;;  %v241_v54 = vld [vmem:[%s2052_s11 + $0x190] sm:$0xff]  ;;  %v306_v55 = vmul.f32 %v242_v53, %v242_v53 }
  0x70   : > { %v305_v56 = vmul.f32 %v241_v54, %v241_v54 }
  0x73   : > { %377 = vadd.xlane.f32.xlu1 %v284_v58  ;;  %375 = vadd.xlane.f32.xlu0 %v283_v59  ;;  %v243_v58 = vld [vmem:[%s2052_s11 + $0x1a0] sm:$0xff]  ;;  %v308_v59 = vmul.f32 %v244_v57, %v244_v57 }
  0x74   : > { %v307_v60 = vmul.f32 %v243_v58, %v243_v58 }
  0x77   : > { %381 = vadd.xlane.f32.xlu1 %v286_v62  ;;  %379 = vadd.xlane.f32.xlu0 %v285_v63  ;;  %v245_v62 = vld [vmem:[%s2052_s11 + $0x1b0] sm:$0xff]  ;;  %v310_v63 = vmul.f32 %v246_v61, %v246_v61 }
  0x78   : > { %v309_v3 = vmul.f32 %v245_v62, %v245_v62 }
  0x7b   : > { %385 = vadd.xlane.f32.xlu1 %v288_v6  ;;  %383 = vadd.xlane.f32.xlu0 %v287_v7  ;;  %v247_v6 = vld [vmem:[%s2052_s11 + $0x1c0] sm:$0xff]  ;;  %v312_v7 = vmul.f32 %v248_v4, %v248_v4 }
  0x7c   : > { %v311_v10 = vmul.f32 %v247_v6, %v247_v6 }
  0x7f   : > { %389 = vadd.xlane.f32.xlu1 %v290_v14  ;;  %387 = vadd.xlane.f32.xlu0 %v289_v15  ;;  %v249_v14 = vld [vmem:[%s2052_s11 + $0x1d0] sm:$0xff]  ;;  %v314_v15 = vmul.f32 %v250_v11, %v250_v11 }
  0x80   : > { %v313_v18 = vmul.f32 %v249_v14, %v249_v14 }
  0x83   : > { %393 = vadd.xlane.f32.xlu1 %v292_v22  ;;  %391 = vadd.xlane.f32.xlu0 %v291_v23  ;;  %v251_v22 = vld [vmem:[%s2052_s11 + $0x1e0] sm:$0xff]  ;;  %v316_v23 = vmul.f32 %v252_v19, %v252_v19 }
  0x84   : > { %v315_v26 = vmul.f32 %v251_v22, %v251_v22 }
  0x87   : > { %397 = vadd.xlane.f32.xlu1 %v294_v30  ;;  %395 = vadd.xlane.f32.xlu0 %v293_v31  ;;  %v253_v30 = vld [vmem:[%s2052_s11 + $0x1f0] sm:$0xff]  ;;  %v318_v31 = vmul.f32 %v254_v27, %v254_v27 }
  0x88   : > { %v317_v33 = vmul.f32 %v253_v30, %v253_v30 }
  0x8b   : > { %401 = vadd.xlane.f32.xlu1 %v296_v35  ;;  %399 = vadd.xlane.f32.xlu0 %v295_v36 }
  0x8f   : > { %405 = vadd.xlane.f32.xlu1 %v298_v39  ;;  %403 = vadd.xlane.f32.xlu0 %v297_v40 }
  0x93   : > { %409 = vadd.xlane.f32.xlu1 %v300_v43  ;;  %407 = vadd.xlane.f32.xlu0 %v299_v44 }
  0x97   : > { %413 = vadd.xlane.f32.xlu1 %v302_v47  ;;  %411 = vadd.xlane.f32.xlu0 %v301_v48 }
  0x9b   : > { %417 = vadd.xlane.f32.xlu1 %v304_v51  ;;  %415 = vadd.xlane.f32.xlu0 %v303_v52 }
  0x9f   : > { %421 = vadd.xlane.f32.xlu1 %v306_v55  ;;  %419 = vadd.xlane.f32.xlu0 %v305_v56 }
  0xa3   : > { %425 = vadd.xlane.f32.xlu1 %v308_v59  ;;  %423 = vadd.xlane.f32.xlu0 %v307_v60 }
  0xa7   : > { %429 = vadd.xlane.f32.xlu1 %v310_v63  ;;  %427 = vadd.xlane.f32.xlu0 %v309_v3 }
  0xab   : > { %433 = vadd.xlane.f32.xlu1 %v312_v7  ;;  %431 = vadd.xlane.f32.xlu0 %v311_v10 }
  0xaf   : > { %437 = vadd.xlane.f32.xlu1 %v314_v15  ;;  %435 = vadd.xlane.f32.xlu0 %v313_v18 }
  0xb3   : > { %441 = vadd.xlane.f32.xlu1 %v316_v23  ;;  %439 = vadd.xlane.f32.xlu0 %v315_v26 }
  0xb7   : > { %445 = vadd.xlane.f32.xlu1 %v318_v31  ;;  %443 = vadd.xlane.f32.xlu0 %v317_v33 }
  0xc8   : > { %v324_v34 = vpop.xlane.xlu1 %323  ;;  %v320_v35 = vpop.xlane.xlu0 %319 }
  0xc9   : > { %v450_v36 = vmul.f32 0.0078125, %v324_v34  ;;  %v448_v37 = vmul.f32 0.0078125, %v320_v35 }
  0xcb   : > { %1513 = vrsqrt.f32 %v450_v36  ;;  %vm528_vm0 = vcmp.eq.f32.partialorder %v450_v36, inf  ;;  %vm530_vm1 = vcmp.eq.f32.partialorder %v450_v36, 0.0  ;;  %v531_v46 = vand.u32 2147483648, %v450_v36 }
  0xcc   : > { %1515 = vrsqrt.f32 %v448_v37  ;;  %v326_v38 = vpop.xlane.xlu1 %325  ;;  %v322_v39 = vpop.xlane.xlu0 %321  ;;  %vm514_vm2 = vcmp.eq.f32.partialorder %v448_v37, inf  ;;  %vm516_vm3 = vcmp.eq.f32.partialorder %v448_v37, 0.0  ;;  %v517_v50 = vand.u32 2147483648, %v448_v37 }
  0xcd   : > { %v451_v40 = vmul.f32 0.0078125, %v326_v38  ;;  %v2190_v41 = vmul.f32 0.0078125, %v322_v39 }
  0xcf   : > { %1517 = vrsqrt.f32 %v451_v40  ;;  %vm535_vm4 = vcmp.eq.f32.partialorder %v451_v40, inf  ;;  %vm537_vm5 = vcmp.eq.f32.partialorder %v451_v40, 0.0  ;;  %v538_v55 = vand.u32 2147483648, %v451_v40 }
  0xd0   : > { %1519 = vrsqrt.f32 %v2190_v41  ;;  %v330_v42 = vpop.xlane.xlu1 %329  ;;  %v328_v43 = vpop.xlane.xlu0 %327  ;;  %vm521_vm6 = vcmp.eq.f32.partialorder %v2190_v41, inf  ;;  %vm523_vm7 = vcmp.eq.f32.partialorder %v2190_v41, 0.0  ;;  %v524_v57 = vand.u32 2147483648, %v2190_v41 }
  0xd1   : > { %v2193_v44 = vmul.f32 0.0078125, %v330_v42  ;;  %v2195_v45 = vmul.f32 0.0078125, %v328_v43 }
  0xd3   : > { %1521 = vrsqrt.f32 %v2193_v44  ;;  %vm549_vm8 = vcmp.eq.f32.partialorder %v2193_v44, inf  ;;  %vm551_vm9 = vcmp.eq.f32.partialorder %v2193_v44, 0.0  ;;  %v552_v3 = vand.u32 2147483648, %v2193_v44 }
  0xd4   : > { %1523 = vrsqrt.f32 %v2195_v45  ;;  %v334_v47 = vpop.xlane.xlu1 %333  ;;  %v332_v48 = vpop.xlane.xlu0 %331  ;;  %vm542_vm10 = vcmp.eq.f32.partialorder %v2195_v45, inf  ;;  %vm544_vm11 = vcmp.eq.f32.partialorder %v2195_v45, 0.0  ;;  %v545_v22 = vand.u32 2147483648, %v2195_v45 }
  0xd5   : > { %v1514_v49 = vpop.eup %1513  ;;  %v2199_v51 = vmul.f32 0.0078125, %v334_v47  ;;  %v2201_v52 = vmul.f32 0.0078125, %v332_v48 }
  0xd6   : > { %v1516_v53 = vpop.eup %1515  ;;  %v527_v54 = vmul.f32 %v1514_v49, %v450_v36 }
  0xd7   : > { %v513_v56 = vmul.f32 %v1516_v53, %v448_v37  ;;  %1525 = vrsqrt.f32 %v2199_v51  ;;  %vm563_vm12 = vcmp.eq.f32.partialorder %v2199_v51, inf  ;;  %vm565_vm13 = vcmp.eq.f32.partialorder %v2199_v51, 0.0 }
  0xd8   : > { %v529_v58 = vsel %vm528_vm0, %v450_v36, %v527_v54  ;;  %1527 = vrsqrt.f32 %v2201_v52  ;;  %v338_v59 = vpop.xlane.xlu1 %337  ;;  %v336_v60 = vpop.xlane.xlu0 %335  ;;  %v566_v38 = vand.u32 2147483648, %v2199_v51  ;;  %vm556_vm14 = vcmp.eq.f32.partialorder %v2201_v52, inf }
  0xd9   : > { %v1518_v61 = vpop.eup %1517  ;;  %v532_v62 = vsel %vm530_vm1, %v531_v46, %v529_v58  ;;  %v515_v63 = vsel %vm514_vm2, %v448_v37, %v513_v56  ;;  %v2216_v11 = vmul.f32 0.0078125, %v338_v59  ;;  %v2220_v18 = vmul.f32 0.0078125, %v336_v60 }
  0xda   : > { %v1520_v4 = vpop.eup %1519  ;;  %v962_v6 = vadd.f32 1e-08, %v532_v62  ;;  %v518_v7 = vsel %vm516_vm3, %v517_v50, %v515_v63  ;;  %v534_v10 = vmul.f32 %v1518_v61, %v451_v40  ;;  %vm558_vm15 = vcmp.eq.f32.partialorder %v2201_v52, 0.0  ;;  %v2271_v61 = vld [vmem:[%s3206_s1] ss:$0 sm:$0xff] }
  0xdb   : > { %v960_v14 = vadd.f32 1e-08, %v518_v7  ;;  %v520_v15 = vmul.f32 %v1520_v4, %v2190_v41  ;;  %vm577_vm0 = vcmp.eq.f32.partialorder %v2216_v11, inf  ;;  %vm579_vm1 = vcmp.eq.f32.partialorder %v2216_v11, 0.0 }
  0xdc   : > { %1529 = vrcp.f32 %v962_v6  ;;  %v536_v19 = vsel %vm535_vm4, %v451_v40, %v534_v10  ;;  %v342_v35 = vpop.xlane.xlu1 %341  ;;  %v340_v39 = vpop.xlane.xlu0 %339  ;;  %v580_v59 = vand.u32 2147483648, %v2216_v11  ;;  %vm570_vm2 = vcmp.eq.f32.partialorder %v2220_v18, inf }
  0xdd   : > { %v1522_v23 = vpop.eup %1521  ;;  %1531 = vrcp.f32 %v960_v14  ;;  %v539_v26 = vsel %vm537_vm5, %v538_v55, %v536_v19  ;;  %v522_v27 = vsel %vm521_vm6, %v2190_v41, %v520_v15  ;;  %v2247_v46 = vmul.f32 0.0078125, %v342_v35  ;;  %v2284_v14 = vld [vmem:[%s3207_s2] ss:$0 sm:$0xff] }
  0xde   : > { %v1524_v30 = vpop.eup %1523  ;;  %v963_v31 = vadd.f32 1e-08, %v539_v26  ;;  %v525_v33 = vsel %vm523_vm7, %v524_v57, %v522_v27  ;;  %v548_v34 = vmul.f32 %v1522_v23, %v2193_v44  ;;  %1533 = vrsqrt.f32 %v2216_v11 }
  0xdf   : > { %v961_v36 = vadd.f32 1e-08, %v525_v33  ;;  %v541_v37 = vmul.f32 %v1524_v30, %v2195_v45  ;;  %1535 = vrsqrt.f32 %v2220_v18  ;;  %v2252_v53 = vmul.f32 0.0078125, %v340_v39 }
  0xe0   : > { %1537 = vrcp.f32 %v963_v31  ;;  %v550_v40 = vsel %vm549_vm8, %v2193_v44, %v548_v34  ;;  %v559_v44 = vand.u32 2147483648, %v2201_v52  ;;  %vm572_vm3 = vcmp.eq.f32.partialorder %v2220_v18, 0.0 }
  0xe1   : > { %v1526_v41 = vpop.eup %1525  ;;  %1539 = vrcp.f32 %v961_v36  ;;  %v553_v42 = vsel %vm551_vm9, %v552_v3, %v550_v40  ;;  %v543_v43 = vsel %vm542_vm10, %v2195_v45, %v541_v37  ;;  %v346_v45 = vpop.xlane.xlu1 %345  ;;  %v573_v15 = vand.u32 2147483648, %v2220_v18 }
  0xe2   : > { %v1528_v47 = vpop.eup %1527  ;;  %v965_v48 = vadd.f32 1e-08, %v553_v42  ;;  %v546_v49 = vsel %vm544_vm11, %v545_v22, %v543_v43  ;;  %v562_v50 = vmul.f32 %v1526_v41, %v2199_v51  ;;  %1541 = vrsqrt.f32 %v2247_v46 }
  0xe3   : > { %v964_v54 = vadd.f32 1e-08, %v546_v49  ;;  %v555_v55 = vmul.f32 %v1528_v47, %v2201_v52  ;;  %v2279_v7 = vmul.f32 0.0078125, %v346_v45  ;;  %vm591_vm4 = vcmp.eq.f32.partialorder %v2247_v46, inf }
  0xe4   : > { %1543 = vrcp.f32 %v965_v48  ;;  %v564_v56 = vsel %vm563_vm12, %v2199_v51, %v562_v50  ;;  %v344_v51 = vpop.xlane.xlu0 %343  ;;  %vm593_vm5 = vcmp.eq.f32.partialorder %v2247_v46, 0.0  ;;  %v594_v35 = vand.u32 2147483648, %v2247_v46 }
  0xe5   : > { %1545 = vrcp.f32 %v964_v54  ;;  %v567_v57 = vsel %vm565_vm13, %v566_v38, %v564_v56  ;;  %v557_v58 = vsel %vm556_vm14, %v2201_v52, %v555_v55  ;;  %v2291_v23 = vmul.f32 0.0078125, %v344_v51  ;;  %v350_v36 = vpop.xlane.xlu1 %349 }
  0xe6   : > { %v1530_v60 = vpop.eup %1529  ;;  %v967_v62 = vadd.f32 1e-08, %v567_v57  ;;  %v560_v63 = vsel %vm558_vm15, %v559_v44, %v557_v58  ;;  %1547 = vrsqrt.f32 %v2252_v53  ;;  %v2322_v50 = vmul.f32 0.0078125, %v350_v36 }
  0xe7   : > { %v1532_v3 = vpop.eup %1531  ;;  %v1091_v4 = vmul.f32 %v1530_v60, %v2059_v0  ;;  %v966_v6 = vadd.f32 1e-08, %v560_v63  ;;  %vm584_vm6 = vcmp.eq.f32.partialorder %v2252_v53, inf  ;;  %vm586_vm7 = vcmp.eq.f32.partialorder %v2252_v53, 0.0 }
  0xe8   : > { %v1534_v10 = vpop.eup %1533  ;;  %v1089_v52 = vmul.f32 %v1532_v3, %v2062_v1  ;;  %1549 = vrcp.f32 %v967_v62  ;;  %v348_v41 = vpop.xlane.xlu0 %347  ;;  %v587_v63 = vand.u32 2147483648, %v2252_v53  ;;  %vm605_vm8 = vcmp.eq.f32.partialorder %v2279_v7, inf }
  0xe9   : > { %v1536_v19 = vpop.eup %1535  ;;  %v1161_v0 = vmul.f32 %v2271_v61, %v1091_v4  ;;  %1551 = vrcp.f32 %v966_v6  ;;  %v576_v22 = vmul.f32 %v1534_v10, %v2216_v11  ;;  %v354_v51 = vpop.xlane.xlu1 %353  ;;  %vm607_vm9 = vcmp.eq.f32.partialorder %v2279_v7, 0.0 }
  0xea   : > { %v1538_v26 = vpop.eup %1537  ;;  %v1159_v27 = vmul.f32 %v2271_v61, %v1089_v52  ;;  %v569_v30 = vmul.f32 %v1536_v19, %v2220_v18  ;;  %1553 = vrsqrt.f32 %v2279_v7  ;;  %vm598_vm10 = vcmp.eq.f32.partialorder %v2291_v23, inf }
  0xeb   : > { %v1540_v1 = vpop.eup %1539  ;;  %v1232_v31 = vadd.f32 %v2284_v14, %v1161_v0  ;;  %v1092_v33 = vmul.f32 %v1538_v26, %v2065_v2  ;;  %v578_v34 = vsel %vm577_vm0, %v2216_v11, %v576_v22  ;;  %1555 = vrsqrt.f32 %v2291_v23 }
  0xec   : > { %v1230_v37 = vadd.f32 %v2284_v14, %v1159_v27  ;;  %v1090_v38 = vmul.f32 %v1540_v1, %v2072_v5  ;;  %v581_v39 = vsel %vm579_vm1, %v580_v59, %v578_v34  ;;  %v571_v40 = vsel %vm570_vm2, %v2220_v18, %v569_v30  ;;  %v1542_v2 = vpop.eup %1541  ;;  %v352_v3 = vpop.xlane.xlu0 %351 }
  0xed   : > { %1296 = vst [vmem:[%s2312_s8 + $0x10] sm:$0xff] %v1232_v31  ;;  %v1162_v42 = vmul.f32 %v2271_v61, %v1092_v33  ;;  %v969_v43 = vadd.f32 1e-08, %v581_v39  ;;  %v574_v5 = vsel %vm572_vm3, %v573_v15, %v571_v40  ;;  %v590_v49 = vmul.f32 %v1542_v2, %v2247_v46 }
  0xee   : > { %v1544_v11 = vpop.eup %1543  ;;  %1294 = vst [vmem:[%s2312_s8] sm:$0xff] %v1230_v37  ;;  %v1160_v47 = vmul.f32 %v2271_v61, %v1090_v38  ;;  %v968_v48 = vadd.f32 1e-08, %v574_v5  ;;  %v608_v30 = vand.u32 2147483648, %v2279_v7  ;;  %v2359_v1 = vmul.f32 0.0078125, %v348_v41  ;;  %v358_v38 = vpop.xlane.xlu1 %357 }
  0xef   : > { %v1546_v54 = vpop.eup %1545  ;;  %v1233_v55 = vadd.f32 %v2284_v14, %v1162_v42  ;;  %v1094_v44 = vmul.f32 %v1544_v11, %v2079_v8  ;;  %1557 = vrcp.f32 %v969_v43  ;;  %v592_v57 = vsel %vm591_vm4, %v2247_v46, %v590_v49 }
  0xf0   : > { %v1548_v18 = vpop.eup %1547  ;;  %v1231_v56 = vadd.f32 %v2284_v14, %v1160_v47  ;;  %v1093_v45 = vmul.f32 %v1546_v54, %v2082_v9  ;;  %1559 = vrcp.f32 %v968_v48  ;;  %v595_v59 = vsel %vm593_vm5, %v594_v35, %v592_v57  ;;  %v356_v39 = vpop.xlane.xlu0 %355 }
  0xf1   : > { %1297 = vst [vmem:[%s2312_s8 + $0x18] sm:$0xff] %v1233_v55  ;;  %v1164_v58 = vmul.f32 %v2271_v61, %v1094_v44  ;;  %v583_v8 = vmul.f32 %v1548_v18, %v2252_v53  ;;  %v971_v9 = vadd.f32 1e-08, %v595_v59  ;;  %1561 = vrsqrt.f32 %v2322_v50 }
  0xf2   : > { %v1550_v60 = vpop.eup %1549  ;;  %1295 = vst [vmem:[%s2312_s8 + $0x8] sm:$0xff] %v1231_v56  ;;  %v1163_v62 = vmul.f32 %v2271_v61, %v1093_v45  ;;  %v2367_v34 = vmul.f32 0.0078125, %v352_v3  ;;  %v601_v2 = vand.u32 2147483648, %v2291_v23  ;;  %vm600_vm11 = vcmp.eq.f32.partialorder %v2291_v23, 0.0  ;;  %v362_v18 = vpop.xlane.xlu1 %361 }
  0xf3   : > { %v1552_v4 = vpop.eup %1551  ;;  %v1235_v46 = vadd.f32 %v2284_v14, %v1164_v58  ;;  %v1096_v6 = vmul.f32 %v1550_v60, %v2089_v12  ;;  %v585_v10 = vsel %vm584_vm6, %v2252_v53, %v583_v8  ;;  %1563 = vrcp.f32 %v971_v9 }
  0xf4   : > { %v1554_v52 = vpop.eup %1553  ;;  %v1234_v15 = vadd.f32 %v2284_v14, %v1163_v62  ;;  %v1095_v19 = vmul.f32 %v1552_v4, %v2092_v13  ;;  %v588_v0 = vsel %vm586_vm7, %v587_v63, %v585_v10  ;;  %v2361_v13 = vmul.f32 0.0078125, %v354_v51  ;;  %v360_v56 = vpop.xlane.xlu0 %359 }
  0xf5   : > { %1299 = vst [vmem:[%s2312_s8 + $0x28] sm:$0xff] %v1235_v46  ;;  %v1166_v22 = vmul.f32 %v2271_v61, %v1096_v6  ;;  %v970_v26 = vadd.f32 1e-08, %v588_v0  ;;  %v604_v12 = vmul.f32 %v1554_v52, %v2279_v7  ;;  %v1556_v53 = vpop.eup %1555  ;;  %v2381_v47 = vmul.f32 0.0078125, %v358_v38 }
  0xf6   : > { %1298 = vst [vmem:[%s2312_s8 + $0x20] sm:$0xff] %v1234_v15  ;;  %v1165_v27 = vmul.f32 %v2271_v61, %v1095_v19  ;;  %v597_v37 = vmul.f32 %v1556_v53, %v2291_v23  ;;  %vm619_vm12 = vcmp.eq.f32.partialorder %v2322_v50, inf  ;;  %vm621_vm13 = vcmp.eq.f32.partialorder %v2322_v50, 0.0 }
  0xf7   : > { %v1237_v31 = vadd.f32 %v2284_v14, %v1166_v22  ;;  %1565 = vrcp.f32 %v970_v26  ;;  %v606_v33 = vsel %vm605_vm8, %v2279_v7, %v604_v12  ;;  %vm612_vm14 = vcmp.eq.f32.partialorder %v2359_v1, inf  ;;  %v366_v22 = vpop.xlane.xlu1 %365 }
  0xf8   : > { %v1236_v35 = vadd.f32 %v2284_v14, %v1165_v27  ;;  %v609_v36 = vsel %vm607_vm9, %v608_v30, %v606_v33  ;;  %1567 = vrsqrt.f32 %v2359_v1  ;;  %v599_v43 = vsel %vm598_vm10, %v2291_v23, %v597_v37 }
  0xf9   : > { %v1558_v40 = vpop.eup %1557  ;;  %1301 = vst [vmem:[%s2312_s8 + $0x38] sm:$0xff] %v1237_v31  ;;  %v973_v41 = vadd.f32 1e-08, %v609_v36  ;;  %1569 = vrsqrt.f32 %v2361_v13  ;;  %v602_v11 = vsel %vm600_vm11, %v601_v2, %v599_v43  ;;  %vm614_vm15 = vcmp.eq.f32.partialorder %v2359_v1, 0.0  ;;  %v364_v2 = vpop.xlane.xlu0 %363 }
  0xfa   : > { %v1560_v42 = vpop.eup %1559  ;;  %1300 = vst [vmem:[%s2312_s8 + $0x30] sm:$0xff] %v1236_v35  ;;  %v1098_v7 = vmul.f32 %v1558_v40, %v2099_v16  ;;  %v972_v54 = vadd.f32 1e-08, %v602_v11  ;;  %v615_v8 = vand.u32 2147483648, %v2359_v1  ;;  %vm633_vm0 = vcmp.eq.f32.partialorder %v2361_v13, inf }
  0xfb   : > { %v1097_v5 = vmul.f32 %v1560_v42, %v2102_v17  ;;  %1571 = vrcp.f32 %v973_v41  ;;  %v1562_v48 = vpop.eup %1561  ;;  %v622_v17 = vand.u32 2147483648, %v2322_v50  ;;  %v2400_v60 = vmul.f32 0.0078125, %v356_v39 }
  0xfc   : > { %v1168_v49 = vmul.f32 %v2271_v61, %v1098_v7  ;;  %1573 = vrsqrt.f32 %v2367_v34  ;;  %v618_v23 = vmul.f32 %v1562_v48, %v2322_v50  ;;  %v2404_v51 = vmul.f32 0.0078125, %v362_v18 }
  0xfd   : > { %v1167_v16 = vmul.f32 %v2271_v61, %v1097_v5  ;;  %v1564_v55 = vpop.eup %1563  ;;  %1575 = vrcp.f32 %v972_v54  ;;  %vm635_vm1 = vcmp.eq.f32.partialorder %v2361_v13, 0.0  ;;  %v636_v4 = vand.u32 2147483648, %v2361_v13 }
  0xfe   : > { %v1239_v44 = vadd.f32 %v2284_v14, %v1168_v49  ;;  %v1100_v57 = vmul.f32 %v1564_v55, %v2109_v20  ;;  %v620_v58 = vsel %vm619_vm12, %v2322_v50, %v618_v23  ;;  %1577 = vrsqrt.f32 %v2381_v47  ;;  %v370_v49 = vpop.xlane.xlu1 %369 }
  0xff   : > { %v1238_v45 = vadd.f32 %v2284_v14, %v1167_v16  ;;  %v623_v59 = vsel %vm621_vm13, %v622_v17, %v620_v58  ;;  %v2406_v20 = vmul.f32 0.0078125, %v360_v56  ;;  %1579 = vrsqrt.f32 %v2400_v60  ;;  %v368_v58 = vpop.xlane.xlu0 %367 }
 0x100   : > { %1303 = vst [vmem:[%s2312_s8 + $0x48] sm:$0xff] %v1239_v44  ;;  %v1170_v9 = vmul.f32 %v2271_v61, %v1100_v57  ;;  %v975_v63 = vadd.f32 1e-08, %v623_v59  ;;  %vm626_vm2 = vcmp.eq.f32.partialorder %v2367_v34, inf  ;;  %vm628_vm3 = vcmp.eq.f32.partialorder %v2367_v34, 0.0 }
 0x101   : > { %v1566_v62 = vpop.eup %1565  ;;  %1302 = vst [vmem:[%s2312_s8 + $0x40] sm:$0xff] %v1238_v45  ;;  %vm647_vm4 = vcmp.eq.f32.partialorder %v2381_v47, inf  ;;  %vm649_vm5 = vcmp.eq.f32.partialorder %v2381_v47, 0.0  ;;  %v650_v35 = vand.u32 2147483648, %v2381_v47  ;;  %vm640_vm6 = vcmp.eq.f32.partialorder %v2400_v60, inf }
 0x102   : > { %v1568_v50 = vpop.eup %1567  ;;  %v1099_v3 = vmul.f32 %v1566_v62, %v2112_v21  ;;  %v1241_v46 = vadd.f32 %v2284_v14, %v1170_v9  ;;  %1581 = vrcp.f32 %v975_v63  ;;  %v629_v21 = vand.u32 2147483648, %v2367_v34 }
 0x103   : > { %v611_v6 = vmul.f32 %v1568_v50, %v2359_v1  ;;  %v1570_v10 = vpop.eup %1569  ;;  %1583 = vrsqrt.f32 %v2404_v51  ;;  %vm642_vm7 = vcmp.eq.f32.partialorder %v2400_v60, 0.0  ;;  %vm661_vm8 = vcmp.eq.f32.partialorder %v2404_v51, inf }
 0x104   : > { %v1169_v52 = vmul.f32 %v2271_v61, %v1099_v3  ;;  %1305 = vst [vmem:[%s2312_s8 + $0x58] sm:$0xff] %v1241_v46  ;;  %v632_v0 = vmul.f32 %v1570_v10, %v2361_v13  ;;  %1585 = vrsqrt.f32 %v2406_v20  ;;  %v2460_v48 = vmul.f32 0.0078125, %v364_v2  ;;  %v374_v46 = vpop.xlane.xlu1 %373 }
 0x105   : > { %v1572_v15 = vpop.eup %1571  ;;  %v613_v19 = vsel %vm612_vm14, %v2359_v1, %v611_v6  ;;  %v2441_v1 = vmul.f32 0.0078125, %v366_v22  ;;  %vm663_vm9 = vcmp.eq.f32.partialorder %v2404_v51, 0.0  ;;  %vm654_vm10 = vcmp.eq.f32.partialorder %v2406_v20, inf }
 0x106   : > { %v1574_v26 = vpop.eup %1573  ;;  %v1240_v12 = vadd.f32 %v2284_v14, %v1169_v52  ;;  %v1102_v27 = vmul.f32 %v1572_v15, %v2119_v24  ;;  %v616_v30 = vsel %vm614_vm15, %v615_v8, %v613_v19  ;;  %v634_v31 = vsel %vm633_vm0, %v2361_v13, %v632_v0 }
 0x107   : > { %v974_v53 = vadd.f32 1e-08, %v616_v30  ;;  %v625_v33 = vmul.f32 %v1574_v26, %v2367_v34  ;;  %v1576_v36 = vpop.eup %1575  ;;  %v637_v24 = vsel %vm635_vm1, %v636_v4, %v634_v31  ;;  %v657_v63 = vand.u32 2147483648, %v2406_v20  ;;  %v372_v26 = vpop.xlane.xlu0 %371 }
 0x108   : > { %1304 = vst [vmem:[%s2312_s8 + $0x50] sm:$0xff] %v1240_v12  ;;  %v1172_v37 = vmul.f32 %v2271_v61, %v1102_v27  ;;  %v1578_v38 = vpop.eup %1577  ;;  %v1101_v39 = vmul.f32 %v1576_v36, %v2122_v25  ;;  %v977_v40 = vadd.f32 1e-08, %v637_v24  ;;  %v2484_v50 = vmul.f32 0.0078125, %v370_v49  ;;  %v378_v24 = vpop.xlane.xlu1 %377 }
 0x109   : > { %1587 = vrcp.f32 %v974_v53  ;;  %v627_v41 = vsel %vm626_vm2, %v2367_v34, %v625_v33  ;;  %v646_v7 = vmul.f32 %v1578_v38, %v2381_v47  ;;  %v1580_v5 = vpop.eup %1579  ;;  %v643_v34 = vand.u32 2147483648, %v2400_v60 }
 0x10a   : > { %v1243_v42 = vadd.f32 %v2284_v14, %v1172_v37  ;;  %v630_v13 = vsel %vm628_vm3, %v629_v21, %v627_v41  ;;  %1589 = vrsqrt.f32 %v2441_v1  ;;  %v1171_v43 = vmul.f32 %v2271_v61, %v1101_v39 }
 0x10b   : > { %1591 = vrcp.f32 %v977_v40  ;;  %v976_v25 = vadd.f32 1e-08, %v630_v13  ;;  %v648_v11 = vsel %vm647_vm4, %v2381_v47, %v646_v7  ;;  %v639_v17 = vmul.f32 %v1580_v5, %v2400_v60  ;;  %v376_v5 = vpop.xlane.xlu0 %375 }
 0x10c   : > { %1307 = vst [vmem:[%s2312_s8 + $0x68] sm:$0xff] %v1243_v42  ;;  %v1582_v54 = vpop.eup %1581  ;;  %v1242_v16 = vadd.f32 %v2284_v14, %v1171_v43  ;;  %v651_v23 = vsel %vm649_vm5, %v650_v35, %v648_v11  ;;  %v664_v47 = vand.u32 2147483648, %v2404_v51  ;;  %vm656_vm11 = vcmp.eq.f32.partialorder %v2406_v20, 0.0 }
 0x10d   : > { %1593 = vrcp.f32 %v976_v25  ;;  %v1584_v55 = vpop.eup %1583  ;;  %v1104_v44 = vmul.f32 %v1582_v54, %v2129_v28  ;;  %v979_v18 = vadd.f32 1e-08, %v651_v23  ;;  %v641_v45 = vsel %vm640_vm6, %v2400_v60, %v639_v17 }
 0x10e   : > { %1595 = vrsqrt.f32 %v2460_v48  ;;  %v1586_v56 = vpop.eup %1585  ;;  %1306 = vst [vmem:[%s2312_s8 + $0x60] sm:$0xff] %v1242_v16  ;;  %v660_v57 = vmul.f32 %v1584_v55, %v2404_v51  ;;  %v644_v59 = vsel %vm642_vm7, %v643_v34, %v641_v45  ;;  %v2491_v21 = vmul.f32 0.0078125, %v368_v58  ;;  %v1771_v55 = vld [vmem:[%s2052_s11 + $0x90] sm:$0xff] }
 0x10f   : > { %v1174_v28 = vmul.f32 %v2271_v61, %v1104_v44  ;;  %1597 = vrcp.f32 %v979_v18  ;;  %v653_v8 = vmul.f32 %v1586_v56, %v2406_v20  ;;  %v978_v62 = vadd.f32 1e-08, %v644_v59  ;;  %v382_v18 = vpop.xlane.xlu1 %381 }
 0x110   : > { %v662_v9 = vsel %vm661_vm8, %v2404_v51, %v660_v57  ;;  %vm675_vm12 = vcmp.eq.f32.partialorder %v2441_v1, inf  ;;  %vm677_vm13 = vcmp.eq.f32.partialorder %v2441_v1, 0.0  ;;  %v2499_v22 = vmul.f32 0.0078125, %v374_v46  ;;  %v380_v46 = vpop.xlane.xlu0 %379 }
 0x111   : > { %v1245_v3 = vadd.f32 %v2284_v14, %v1174_v28  ;;  %v665_v4 = vsel %vm663_vm9, %v664_v47, %v662_v9  ;;  %v655_v60 = vsel %vm654_vm10, %v2406_v20, %v653_v8  ;;  %1599 = vrcp.f32 %v978_v62  ;;  %v1772_v28 = vld [vmem:[%s2052_s11 + $0xa8] sm:$0xff]  ;;  %v1773_v9 = vld [vmem:[%s2052_s11 + $0xa0] sm:$0xff] }
 0x112   : > { %v981_v10 = vadd.f32 1e-08, %v665_v4  ;;  %v658_v52 = vsel %vm656_vm11, %v657_v63, %v655_v60  ;;  %1601 = vrsqrt.f32 %v2484_v50  ;;  %vm668_vm14 = vcmp.eq.f32.partialorder %v2460_v48, inf }
 0x113   : > { %v1588_v6 = vpop.eup %1587  ;;  %1309 = vst [vmem:[%s2312_s8 + $0x78] sm:$0xff] %v1245_v3  ;;  %v980_v0 = vadd.f32 1e-08, %v658_v52  ;;  %vm670_vm15 = vcmp.eq.f32.partialorder %v2460_v48, 0.0  ;;  %v671_v40 = vand.u32 2147483648, %v2460_v48  ;;  %vm689_vm0 = vcmp.eq.f32.partialorder %v2484_v50, inf }
 0x114   : > { %v1590_v15 = vpop.eup %1589  ;;  %v1103_v19 = vmul.f32 %v1588_v6, %v2132_v29  ;;  %1603 = vrcp.f32 %v981_v10  ;;  %v678_v29 = vand.u32 2147483648, %v2441_v1  ;;  %v2520_v13 = vmul.f32 0.0078125, %v372_v26 }
 0x115   : > { %v1592_v51 = vpop.eup %1591  ;;  %v674_v20 = vmul.f32 %v1590_v15, %v2441_v1  ;;  %1605 = vrcp.f32 %v980_v0  ;;  %v2526_v25 = vmul.f32 0.0078125, %v378_v24  ;;  %vm691_vm1 = vcmp.eq.f32.partialorder %v2484_v50, 0.0 }
 0x116   : > { %v1173_v12 = vmul.f32 %v2271_v61, %v1103_v19  ;;  %v1106_v27 = vmul.f32 %v1592_v51, %v2139_v32  ;;  %1607 = vrsqrt.f32 %v2491_v21  ;;  %v1769_v32 = vld [vmem:[%s2052_s11 + $0x80] sm:$0xff]  ;;  %v692_v23 = vand.u32 2147483648, %v2484_v50 }
 0x117   : > { %v1594_v30 = vpop.eup %1593  ;;  %v676_v53 = vsel %vm675_vm12, %v2441_v1, %v674_v20  ;;  %1609 = vrsqrt.f32 %v2499_v22  ;;  %v1770_v1 = vld [vmem:[%s2052_s11 + $0x98] sm:$0xff]  ;;  %vm682_vm2 = vcmp.eq.f32.partialorder %v2491_v21, inf  ;;  %vm684_vm3 = vcmp.eq.f32.partialorder %v2491_v21, 0.0 }
 0x118   : > { %v1596_v31 = vpop.eup %1595  ;;  %v1244_v33 = vadd.f32 %v2284_v14, %v1173_v12  ;;  %v1176_v35 = vmul.f32 %v2271_v61, %v1106_v27  ;;  %v1105_v36 = vmul.f32 %v1769_v32, %v1594_v30  ;;  %v679_v37 = vsel %vm677_vm13, %v678_v29, %v676_v53  ;;  %v386_v12 = vpop.xlane.xlu1 %385 }
 0x119   : > { %v983_v38 = vadd.f32 1e-08, %v679_v37  ;;  %v667_v39 = vmul.f32 %v1596_v31, %v2460_v48  ;;  %v1598_v41 = vpop.eup %1597  ;;  %vm703_vm4 = vcmp.eq.f32.partialorder %v2499_v22, inf  ;;  %vm705_vm5 = vcmp.eq.f32.partialorder %v2499_v22, 0.0 }
 0x11a   : > { %1308 = vst [vmem:[%s2312_s8 + $0x70] sm:$0xff] %v1244_v33  ;;  %v1247_v2 = vadd.f32 %v2284_v14, %v1176_v35  ;;  %v1175_v42 = vmul.f32 %v2271_v61, %v1105_v36  ;;  %v1108_v7 = vmul.f32 %v1770_v1, %v1598_v41  ;;  %v2548_v8 = vmul.f32 0.0078125, %v376_v5  ;;  %v1774_v33 = vld [vmem:[%s2052_s11 + $0xb8] sm:$0xff]  ;;  %v1775_v5 = vld [vmem:[%s2052_s11 + $0xb0] sm:$0xff] }
 0x11b   : > { %1611 = vrcp.f32 %v983_v38  ;;  %v669_v43 = vsel %vm668_vm14, %v2460_v48, %v667_v39  ;;  %v1600_v49 = vpop.eup %1599  ;;  %v685_v48 = vand.u32 2147483648, %v2491_v21  ;;  %v706_v4 = vand.u32 2147483648, %v2499_v22  ;;  %v384_v38 = vpop.xlane.xlu0 %383 }
 0x11c   : > { %1311 = vst [vmem:[%s2312_s8 + $0x88] sm:$0xff] %v1247_v2  ;;  %v1246_v11 = vadd.f32 %v2284_v14, %v1175_v42  ;;  %v672_v34 = vsel %vm670_vm15, %v671_v40, %v669_v43  ;;  %1613 = vrsqrt.f32 %v2520_v13  ;;  %v1178_v54 = vmul.f32 %v2271_v61, %v1108_v7  ;;  %v1602_v17 = vpop.eup %1601 }
 0x11d   : > { %v982_v16 = vadd.f32 1e-08, %v672_v34  ;;  %v1107_v44 = vmul.f32 %v1771_v55, %v1600_v49  ;;  %1615 = vrsqrt.f32 %v2526_v25  ;;  %v688_v57 = vmul.f32 %v1602_v17, %v2484_v50  ;;  %v390_v49 = vpop.xlane.xlu1 %389 }
 0x11e   : > { %1310 = vst [vmem:[%s2312_s8 + $0x80] sm:$0xff] %v1246_v11  ;;  %v1604_v56 = vpop.eup %1603  ;;  %v1249_v45 = vadd.f32 %v2284_v14, %v1178_v54  ;;  %v2556_v60 = vmul.f32 0.0078125, %v382_v18  ;;  %vm696_vm6 = vcmp.eq.f32.partialorder %v2520_v13, inf  ;;  %vm698_vm7 = vcmp.eq.f32.partialorder %v2520_v13, 0.0 }
 0x11f   : > { %1617 = vrcp.f32 %v982_v16  ;;  %v1606_v47 = vpop.eup %1605  ;;  %v1177_v58 = vmul.f32 %v2271_v61, %v1107_v44  ;;  %v1110_v59 = vmul.f32 %v1772_v28, %v1604_v56  ;;  %v690_v3 = vsel %vm689_vm0, %v2484_v50, %v688_v57  ;;  %v1776_v28 = vld [vmem:[%s2052_s11 + $0xc8] sm:$0xff] }
 0x120   : > { %v1608_v62 = vpop.eup %1607  ;;  %1313 = vst [vmem:[%s2312_s8 + $0x98] sm:$0xff] %v1249_v45  ;;  %v1109_v63 = vmul.f32 %v1773_v9, %v1606_v47  ;;  %v693_v52 = vsel %vm691_vm1, %v692_v23, %v690_v3  ;;  %1619 = vrsqrt.f32 %v2548_v8  ;;  %v2576_v53 = vmul.f32 0.0078125, %v380_v46 }
 0x121   : > { %v1248_v6 = vadd.f32 %v2284_v14, %v1177_v58  ;;  %v1180_v10 = vmul.f32 %v2271_v61, %v1110_v59  ;;  %v681_v15 = vmul.f32 %v1608_v62, %v2491_v21  ;;  %v1610_v19 = vpop.eup %1609  ;;  %v985_v51 = vadd.f32 1e-08, %v693_v52  ;;  %v394_v9 = vpop.xlane.xlu1 %393 }
 0x122   : > { %v1179_v0 = vmul.f32 %v2271_v61, %v1109_v63  ;;  %v702_v26 = vmul.f32 %v1610_v19, %v2499_v22  ;;  %v699_v24 = vand.u32 2147483648, %v2520_v13  ;;  %vm717_vm8 = vcmp.eq.f32.partialorder %v2526_v25, inf  ;;  %v1777_v19 = vld [vmem:[%s2052_s11 + $0xc0] sm:$0xff] }
 0x123   : > { %1312 = vst [vmem:[%s2312_s8 + $0x90] sm:$0xff] %v1248_v6  ;;  %v1251_v20 = vadd.f32 %v2284_v14, %v1180_v10  ;;  %v683_v50 = vsel %vm682_vm2, %v2491_v21, %v681_v15  ;;  %1621 = vrcp.f32 %v985_v51  ;;  %v2591_v2 = vmul.f32 0.0078125, %v386_v12 }
 0x124   : > { %v1250_v29 = vadd.f32 %v2284_v14, %v1179_v0  ;;  %v686_v30 = vsel %vm684_vm3, %v685_v48, %v683_v50  ;;  %v704_v36 = vsel %vm703_vm4, %v2499_v22, %v702_v26  ;;  %1623 = vrsqrt.f32 %v2556_v60 }
 0x125   : > { %v1612_v27 = vpop.eup %1611  ;;  %1315 = vst [vmem:[%s2312_s8 + $0xa8] sm:$0xff] %v1251_v20  ;;  %v984_v32 = vadd.f32 1e-08, %v686_v30  ;;  %v707_v37 = vsel %vm705_vm5, %v706_v4, %v704_v36  ;;  %v720_v7 = vand.u32 2147483648, %v2526_v25  ;;  %vm719_vm9 = vcmp.eq.f32.partialorder %v2526_v25, 0.0  ;;  %v1778_v30 = vld [vmem:[%s2052_s11 + $0xd8] sm:$0xff] }
 0x126   : > { %v1614_v31 = vpop.eup %1613  ;;  %v1112_v35 = vmul.f32 %v1774_v33, %v1612_v27  ;;  %1314 = vst [vmem:[%s2312_s8 + $0xa0] sm:$0xff] %v1250_v29  ;;  %v987_v41 = vadd.f32 1e-08, %v707_v37  ;;  %vm710_vm10 = vcmp.eq.f32.partialorder %v2548_v8, inf  ;;  %vm712_vm11 = vcmp.eq.f32.partialorder %v2548_v8, 0.0 }
 0x127   : > { %v695_v21 = vmul.f32 %v1614_v31, %v2520_v13  ;;  %v1616_v39 = vpop.eup %1615  ;;  %1625 = vrcp.f32 %v984_v32  ;;  %v713_v44 = vand.u32 2147483648, %v2548_v8  ;;  %vm731_vm12 = vcmp.eq.f32.partialorder %v2556_v60, inf }
 0x128   : > { %v1182_v40 = vmul.f32 %v2271_v61, %v1112_v35  ;;  %v716_v1 = vmul.f32 %v1616_v39, %v2526_v25  ;;  %1627 = vrsqrt.f32 %v2576_v53  ;;  %v2616_v56 = vmul.f32 0.0078125, %v384_v38  ;;  %v1779_v39 = vld [vmem:[%s2052_s11 + $0xd0] sm:$0xff] }
 0x129   : > { %v1618_v42 = vpop.eup %1617  ;;  %v697_v22 = vsel %vm696_vm6, %v2520_v13, %v695_v21  ;;  %1629 = vrcp.f32 %v987_v41  ;;  %v2618_v45 = vmul.f32 0.0078125, %v390_v49  ;;  %vm733_vm13 = vcmp.eq.f32.partialorder %v2556_v60, 0.0 }
 0x12a   : > { %v1253_v43 = vadd.f32 %v2284_v14, %v1182_v40  ;;  %v1111_v11 = vmul.f32 %v1775_v5, %v1618_v42  ;;  %v700_v34 = vsel %vm698_vm7, %v699_v24, %v697_v22  ;;  %v718_v16 = vsel %vm717_vm8, %v2526_v25, %v716_v1  ;;  %v1620_v13 = vpop.eup %1619  ;;  %v388_v25 = vpop.xlane.xlu0 %387 }
 0x12b   : > { %v986_v54 = vadd.f32 1e-08, %v700_v34  ;;  %v721_v17 = vsel %vm719_vm9, %v720_v7, %v718_v16  ;;  %1631 = vrsqrt.f32 %v2591_v2  ;;  %v709_v18 = vmul.f32 %v1620_v13, %v2548_v8 }
 0x12c   : > { %1317 = vst [vmem:[%s2312_s8 + $0xb8] sm:$0xff] %v1253_v43  ;;  %v1181_v23 = vmul.f32 %v2271_v61, %v1111_v11  ;;  %v989_v55 = vadd.f32 1e-08, %v721_v17  ;;  %v734_v47 = vand.u32 2147483648, %v2556_v60  ;;  %vm724_vm14 = vcmp.eq.f32.partialorder %v2576_v53, inf  ;;  %v1780_v11 = vld [vmem:[%s2052_s11 + $0xe8] sm:$0xff] }
 0x12d   : > { %1633 = vrcp.f32 %v986_v54  ;;  %v1622_v57 = vpop.eup %1621  ;;  %v711_v62 = vsel %vm710_vm10, %v2548_v8, %v709_v18  ;;  %vm726_vm15 = vcmp.eq.f32.partialorder %v2576_v53, 0.0  ;;  %v727_v4 = vand.u32 2147483648, %v2576_v53 }
 0x12e   : > { %v1252_v48 = vadd.f32 %v2284_v14, %v1181_v23  ;;  %1635 = vrcp.f32 %v989_v55  ;;  %v1624_v58 = vpop.eup %1623  ;;  %v1114_v59 = vmul.f32 %v1776_v28, %v1622_v57  ;;  %v714_v63 = vsel %vm712_vm11, %v713_v44, %v711_v62  ;;  %v392_v20 = vpop.xlane.xlu0 %391  ;;  %v1781_v62 = vld [vmem:[%s2052_s11 + $0xe0] sm:$0xff] }
 0x12f   : > { %1637 = vrsqrt.f32 %v2616_v56  ;;  %v730_v3 = vmul.f32 %v1624_v58, %v2556_v60  ;;  %v2634_v46 = vmul.f32 0.0078125, %v388_v25  ;;  %v988_v52 = vadd.f32 1e-08, %v714_v63 }
 0x130   : > { %1316 = vst [vmem:[%s2312_s8 + $0xb0] sm:$0xff] %v1252_v48  ;;  %v1184_v10 = vmul.f32 %v2271_v61, %v1114_v59  ;;  %vm745_vm0 = vcmp.eq.f32.partialorder %v2591_v2, inf  ;;  %1639 = vrsqrt.f32 %v2618_v45  ;;  %vm747_vm1 = vcmp.eq.f32.partialorder %v2591_v2, 0.0 }
 0x131   : > { %v1626_v6 = vpop.eup %1625  ;;  %v732_v8 = vsel %vm731_vm12, %v2556_v60, %v730_v3  ;;  %v2644_v51 = vmul.f32 0.0078125, %v394_v9  ;;  %1641 = vrcp.f32 %v988_v52  ;;  %v748_v60 = vand.u32 2147483648, %v2591_v2 }
 0x132   : > { %v1628_v15 = vpop.eup %1627  ;;  %v1113_v0 = vmul.f32 %v1777_v19, %v1626_v6  ;;  %v1255_v26 = vadd.f32 %v2284_v14, %v1184_v10  ;;  %v735_v12 = vsel %vm733_vm13, %v734_v47, %v732_v8  ;;  %1643 = vrsqrt.f32 %v2634_v46  ;;  %v396_v23 = vpop.xlane.xlu0 %395  ;;  %v1782_v8 = vld [vmem:[%s2052_s11 + $0xf8] sm:$0xff] }
 0x133   : > { %v1630_v50 = vpop.eup %1629  ;;  %v723_v27 = vmul.f32 %v1628_v15, %v2576_v53  ;;  %v991_v33 = vadd.f32 1e-08, %v735_v12  ;;  %vm738_vm2 = vcmp.eq.f32.partialorder %v2616_v56, inf  ;;  %v2659_v36 = vmul.f32 0.0078125, %v392_v20 }
 0x134   : > { %v1183_v29 = vmul.f32 %v2271_v61, %v1113_v0  ;;  %v1116_v31 = vmul.f32 %v1778_v30, %v1630_v50  ;;  %1319 = vst [vmem:[%s2312_s8 + $0xc8] sm:$0xff] %v1255_v26  ;;  %vm740_vm3 = vcmp.eq.f32.partialorder %v2616_v56, 0.0  ;;  %v741_v7 = vand.u32 2147483648, %v2616_v56 }
 0x135   : > { %v1632_v35 = vpop.eup %1631  ;;  %v725_v32 = vsel %vm724_vm14, %v2576_v53, %v723_v27  ;;  %1645 = vrcp.f32 %v991_v33  ;;  %vm759_vm4 = vcmp.eq.f32.partialorder %v2618_v45, inf  ;;  %v398_v53 = vpop.xlane.xlu1 %397  ;;  %vm761_vm5 = vcmp.eq.f32.partialorder %v2618_v45, 0.0 }
 0x136   : > { %v1254_v21 = vadd.f32 %v2284_v14, %v1183_v29  ;;  %v1186_v24 = vmul.f32 %v2271_v61, %v1116_v31  ;;  %v728_v38 = vsel %vm726_vm15, %v727_v4, %v725_v32  ;;  %v744_v42 = vmul.f32 %v1632_v35, %v2591_v2  ;;  %v400_v50 = vpop.xlane.xlu0 %399  ;;  %v1783_v32 = vld [vmem:[%s2052_s11 + $0xf0] sm:$0xff] }
 0x137   : > { %v1634_v37 = vpop.eup %1633  ;;  %v990_v41 = vadd.f32 1e-08, %v728_v38  ;;  %1647 = vrsqrt.f32 %v2644_v51  ;;  %v762_v25 = vand.u32 2147483648, %v2618_v45  ;;  %vm752_vm6 = vcmp.eq.f32.partialorder %v2634_v46, inf }
 0x138   : > { %v1115_v40 = vmul.f32 %v1779_v39, %v1634_v37  ;;  %v1636_v22 = vpop.eup %1635  ;;  %1318 = vst [vmem:[%s2312_s8 + $0xc0] sm:$0xff] %v1254_v21  ;;  %v1257_v1 = vadd.f32 %v2284_v14, %v1186_v24  ;;  %v746_v49 = vsel %vm745_vm0, %v2591_v2, %v744_v42  ;;  %v2692_v18 = vmul.f32 0.0078125, %v398_v53 }
 0x139   : > { %v1638_v43 = vpop.eup %1637  ;;  %v1118_v34 = vmul.f32 %v1780_v11, %v1636_v22  ;;  %1649 = vrcp.f32 %v990_v41  ;;  %v749_v54 = vsel %vm747_vm1, %v748_v60, %v746_v49  ;;  %v2698_v28 = vmul.f32 0.0078125, %v396_v23  ;;  %v402_v4 = vpop.xlane.xlu1 %401 }
 0x13a   : > { %v1185_v5 = vmul.f32 %v2271_v61, %v1115_v40  ;;  %1321 = vst [vmem:[%s2312_s8 + $0xd8] sm:$0xff] %v1257_v1  ;;  %v737_v16 = vmul.f32 %v1638_v43, %v2616_v56  ;;  %1651 = vrsqrt.f32 %v2659_v36  ;;  %v1640_v17 = vpop.eup %1639  ;;  %v993_v44 = vadd.f32 1e-08, %v749_v54  ;;  %v1784_v43 = vld [vmem:[%s2052_s11 + $0x108] sm:$0xff] }
 0x13b   : > { %v1188_v55 = vmul.f32 %v2271_v61, %v1118_v34  ;;  %v758_v48 = vmul.f32 %v1640_v17, %v2618_v45  ;;  %v1642_v57 = vpop.eup %1641  ;;  %vm754_vm7 = vcmp.eq.f32.partialorder %v2634_v46, 0.0  ;;  %v755_v10 = vand.u32 2147483648, %v2634_v46 }
 0x13c   : > { %v1256_v13 = vadd.f32 %v2284_v14, %v1185_v5  ;;  %v739_v2 = vsel %vm738_vm2, %v2616_v56, %v737_v16  ;;  %1653 = vrcp.f32 %v993_v44  ;;  %v1644_v59 = vpop.eup %1643  ;;  %v1117_v9 = vmul.f32 %v1781_v62, %v1642_v57  ;;  %v2758_v16 = vld [vmem:[%s3206_s1] ss:$0 sm:$0xff] }
 0x13d   : > { %v1259_v47 = vadd.f32 %v2284_v14, %v1188_v55  ;;  %v742_v58 = vsel %vm740_vm3, %v741_v7, %v739_v2  ;;  %v760_v3 = vsel %vm759_vm4, %v2618_v45, %v758_v48  ;;  %1655 = vrsqrt.f32 %v2692_v18  ;;  %v406_v24 = vpop.xlane.xlu1 %405  ;;  %v1786_v44 = vld [vmem:[%s2052_s11 + $0x100] sm:$0xff] }
 0x13e   : > { %1320 = vst [vmem:[%s2312_s8 + $0xd0] sm:$0xff] %v1256_v13  ;;  %v992_v63 = vadd.f32 1e-08, %v742_v58  ;;  %v763_v6 = vsel %vm761_vm5, %v762_v25, %v760_v3  ;;  %v751_v56 = vmul.f32 %v1644_v59, %v2634_v46  ;;  %v1187_v15 = vmul.f32 %v2271_v61, %v1117_v9 }
 0x13f   : > { %1323 = vst [vmem:[%s2312_s8 + $0xe8] sm:$0xff] %v1259_v47  ;;  %v1646_v52 = vpop.eup %1645  ;;  %v995_v19 = vadd.f32 1e-08, %v763_v6  ;;  %vm773_vm8 = vcmp.eq.f32.partialorder %v2644_v51, inf  ;;  %vm775_vm9 = vcmp.eq.f32.partialorder %v2644_v51, 0.0  ;;  %v776_v33 = vand.u32 2147483648, %v2644_v51 }
 0x140   : > { %1657 = vrcp.f32 %v992_v63  ;;  %v1120_v20 = vmul.f32 %v1782_v8, %v1646_v52  ;;  %v753_v45 = vsel %vm752_vm6, %v2634_v46, %v751_v56  ;;  %v1258_v26 = vadd.f32 %v2284_v14, %v1187_v15  ;;  %v2774_v47 = vld [vmem:[%s3207_s2] ss:$0 sm:$0xff]  ;;  %v1788_v63 = vld [vmem:[%s2052_s11 + $0x118] sm:$0xff]  ;;  %v1789_v8 = vld [vmem:[%s2052_s11 + $0x110] sm:$0xff] }
 0x141   : > { %v1648_v0 = vpop.eup %1647  ;;  %1659 = vrsqrt.f32 %v2698_v28  ;;  %v756_v12 = vsel %vm754_vm7, %v755_v10, %v753_v45  ;;  %vm766_vm10 = vcmp.eq.f32.partialorder %v2659_v36, inf  ;;  %v2731_v37 = vmul.f32 0.0078125, %v402_v4  ;;  %v410_v13 = vpop.xlane.xlu1 %409 }
 0x142   : > { %1661 = vrcp.f32 %v995_v19  ;;  %v772_v27 = vmul.f32 %v1648_v0, %v2644_v51  ;;  %v1190_v30 = vmul.f32 %v2271_v61, %v1120_v20  ;;  %v994_v31 = vadd.f32 1e-08, %v756_v12  ;;  %1322 = vst [vmem:[%s2312_s8 + $0xe0] sm:$0xff] %v1258_v26 }
 0x143   : > { %v1650_v29 = vpop.eup %1649  ;;  %v2733_v21 = vmul.f32 0.0078125, %v400_v50  ;;  %v769_v22 = vand.u32 2147483648, %v2659_v36  ;;  %vm768_vm11 = vcmp.eq.f32.partialorder %v2659_v36, 0.0  ;;  %vm787_vm12 = vcmp.eq.f32.partialorder %v2692_v18, inf }
 0x144   : > { %v1652_v35 = vpop.eup %1651  ;;  %v1119_v60 = vmul.f32 %v1783_v32, %v1650_v29  ;;  %v774_v46 = vsel %vm773_vm8, %v2644_v51, %v772_v27  ;;  %v1261_v38 = vadd.f32 %v2284_v14, %v1190_v30  ;;  %1663 = vrcp.f32 %v994_v31  ;;  %v404_v51 = vpop.xlane.xlu0 %403 }
 0x145   : > { %v777_v39 = vsel %vm775_vm9, %v776_v33, %v774_v46  ;;  %v765_v40 = vmul.f32 %v1652_v35, %v2659_v36  ;;  %1665 = vrsqrt.f32 %v2731_v37  ;;  %vm789_vm13 = vcmp.eq.f32.partialorder %v2692_v18, 0.0  ;;  %v414_v31 = vpop.xlane.xlu1 %413  ;;  %v1790_v33 = vld [vmem:[%s2052_s11 + $0x128] sm:$0xff] }
 0x146   : > { %v1189_v41 = vmul.f32 %v2271_v61, %v1119_v60  ;;  %v997_v42 = vadd.f32 1e-08, %v777_v39  ;;  %v1654_v1 = vpop.eup %1653  ;;  %1325 = vst [vmem:[%s2312_s8 + $0xf8] sm:$0xff] %v1261_v38  ;;  %1667 = vrsqrt.f32 %v2733_v21  ;;  %vm780_vm14 = vcmp.eq.f32.partialorder %v2698_v28, inf }
 0x147   : > { %v767_v7 = vsel %vm766_vm10, %v2659_v36, %v765_v40  ;;  %v1656_v61 = vpop.eup %1655  ;;  %v1122_v5 = vmul.f32 %v1784_v43, %v1654_v1  ;;  %v790_v36 = vand.u32 2147483648, %v2692_v18  ;;  %v2762_v23 = vmul.f32 0.0078125, %v406_v24 }
 0x148   : > { %v1260_v53 = vadd.f32 %v2284_v14, %v1189_v41  ;;  %1669 = vrcp.f32 %v997_v42  ;;  %v770_v11 = vsel %vm768_vm11, %v769_v22, %v767_v7  ;;  %v786_v49 = vmul.f32 %v1656_v61, %v2692_v18 }
 0x149   : > { %v996_v34 = vadd.f32 1e-08, %v770_v11  ;;  %v1192_v14 = vmul.f32 %v2758_v16, %v1122_v5  ;;  %v2764_v17 = vmul.f32 0.0078125, %v404_v51  ;;  %v783_v48 = vand.u32 2147483648, %v2698_v28 }
 0x14a   : > { %v1658_v54 = vpop.eup %1657  ;;  %1324 = vst [vmem:[%s2312_s8 + $0xf0] sm:$0xff] %v1260_v53  ;;  %v788_v2 = vsel %vm787_vm12, %v2692_v18, %v786_v49  ;;  %v2783_v6 = vmul.f32 0.0078125, %v410_v13  ;;  %vm782_vm15 = vcmp.eq.f32.partialorder %v2698_v28, 0.0  ;;  %vm801_vm0 = vcmp.eq.f32.partialorder %v2731_v37, inf  ;;  %v408_v18 = vpop.xlane.xlu0 %407 }
 0x14b   : > { %v1660_v55 = vpop.eup %1659  ;;  %v1121_v25 = vmul.f32 %v1786_v44, %v1658_v54  ;;  %1671 = vrcp.f32 %v996_v34  ;;  %v1263_v58 = vadd.f32 %v2774_v47, %v1192_v14  ;;  %v791_v59 = vsel %vm789_vm13, %v790_v36, %v788_v2  ;;  %v418_v13 = vpop.xlane.xlu1 %417  ;;  %v1792_v44 = vld [vmem:[%s2052_s11 + $0x138] sm:$0xff] }
 0x14c   : > { %v1662_v57 = vpop.eup %1661  ;;  %v779_v62 = vmul.f32 %v1660_v55, %v2698_v28  ;;  %1673 = vrsqrt.f32 %v2762_v23  ;;  %v999_v4 = vadd.f32 1e-08, %v791_v59  ;;  %vm803_vm1 = vcmp.eq.f32.partialorder %v2731_v37, 0.0 }
 0x14d   : > { %v1191_v9 = vmul.f32 %v2758_v16, %v1121_v25  ;;  %v1124_v3 = vmul.f32 %v1788_v63, %v1662_v57  ;;  %1327 = vst [vmem:[%s2312_s8 + $0x108] sm:$0xff] %v1263_v58  ;;  %1675 = vrsqrt.f32 %v2764_v17  ;;  %vm794_vm2 = vcmp.eq.f32.partialorder %v2733_v21, inf }
 0x14e   : > { %v781_v56 = vsel %vm780_vm14, %v2698_v28, %v779_v62  ;;  %v1664_v10 = vpop.eup %1663  ;;  %1677 = vrcp.f32 %v999_v4  ;;  %v804_v28 = vand.u32 2147483648, %v2731_v37  ;;  %vm796_vm3 = vcmp.eq.f32.partialorder %v2733_v21, 0.0  ;;  %v412_v40 = vpop.xlane.xlu0 %411 }
 0x14f   : > { %v1262_v52 = vadd.f32 %v2774_v47, %v1191_v9  ;;  %v1194_v15 = vmul.f32 %v2758_v16, %v1124_v3  ;;  %v784_v19 = vsel %vm782_vm15, %v783_v48, %v781_v56  ;;  %v1666_v0 = vpop.eup %1665  ;;  %v1123_v20 = vmul.f32 %v1789_v8, %v1664_v10 }
 0x150   : > { %v998_v45 = vadd.f32 1e-08, %v784_v19  ;;  %v1668_v50 = vpop.eup %1667  ;;  %v800_v12 = vmul.f32 %v1666_v0, %v2731_v37  ;;  %1679 = vrsqrt.f32 %v2783_v6  ;;  %v797_v60 = vand.u32 2147483648, %v2733_v21 }
 0x151   : > { %1326 = vst [vmem:[%s2312_s8 + $0x100] sm:$0xff] %v1262_v52  ;;  %v1265_v26 = vadd.f32 %v2774_v47, %v1194_v15  ;;  %v1193_v29 = vmul.f32 %v2758_v16, %v1123_v20  ;;  %v793_v30 = vmul.f32 %v1668_v50, %v2733_v21  ;;  %vm815_vm4 = vcmp.eq.f32.partialorder %v2762_v23, inf  ;;  %v422_v20 = vpop.xlane.xlu1 %421 }
 0x152   : > { %v1670_v27 = vpop.eup %1669  ;;  %1681 = vrcp.f32 %v998_v45  ;;  %v802_v32 = vsel %vm801_vm0, %v2731_v37, %v800_v12  ;;  %v2818_v39 = vmul.f32 0.0078125, %v408_v18  ;;  %v2823_v7 = vmul.f32 0.0078125, %v414_v31  ;;  %v1791_v37 = vld [vmem:[%s2052_s11 + $0x120] sm:$0xff]  ;;  %v416_v48 = vpop.xlane.xlu0 %415  ;;  %v1793_v18 = vld [vmem:[%s2052_s11 + $0x130] sm:$0xff] }
 0x153   : > { %1329 = vst [vmem:[%s2312_s8 + $0x118] sm:$0xff] %v1265_v26  ;;  %v1126_v35 = vmul.f32 %v1790_v33, %v1670_v27  ;;  %v1264_v46 = vadd.f32 %v2774_v47, %v1193_v29  ;;  %v805_v24 = vsel %vm803_vm1, %v804_v28, %v802_v32  ;;  %v795_v38 = vsel %vm794_vm2, %v2733_v21, %v793_v30  ;;  %v1794_v30 = vld [vmem:[%s2052_s11 + $0x148] sm:$0xff]  ;;  %v1795_v32 = vld [vmem:[%s2052_s11 + $0x140] sm:$0xff] }
 0x154   : > { %v1001_v22 = vadd.f32 1e-08, %v805_v24  ;;  %v798_v1 = vsel %vm796_vm3, %v797_v60, %v795_v38  ;;  %vm817_vm5 = vcmp.eq.f32.partialorder %v2762_v23, 0.0  ;;  %1683 = vrsqrt.f32 %v2818_v39 }
 0x155   : > { %v1672_v41 = vpop.eup %1671  ;;  %v1196_v42 = vmul.f32 %v2758_v16, %v1126_v35  ;;  %1328 = vst [vmem:[%s2312_s8 + $0x110] sm:$0xff] %v1264_v46  ;;  %v1000_v53 = vadd.f32 1e-08, %v798_v1  ;;  %v818_v21 = vand.u32 2147483648, %v2762_v23  ;;  %vm808_vm6 = vcmp.eq.f32.partialorder %v2764_v17, inf }
 0x156   : > { %v1674_v51 = vpop.eup %1673  ;;  %v1125_v61 = vmul.f32 %v1791_v37, %v1672_v41  ;;  %1685 = vrcp.f32 %v1001_v22  ;;  %vm810_vm7 = vcmp.eq.f32.partialorder %v2764_v17, 0.0  ;;  %v811_v14 = vand.u32 2147483648, %v2764_v17  ;;  %v420_v27 = vpop.xlane.xlu0 %419 }
 0x157   : > { %v1267_v43 = vadd.f32 %v2774_v47, %v1196_v42  ;;  %v814_v5 = vmul.f32 %v1674_v51, %v2762_v23  ;;  %v1676_v11 = vpop.eup %1675  ;;  %1687 = vrcp.f32 %v1000_v53  ;;  %vm829_vm8 = vcmp.eq.f32.partialorder %v2783_v6, inf  ;;  %v426_v51 = vpop.xlane.xlu1 %425 }
 0x158   : > { %v1195_v34 = vmul.f32 %v2758_v16, %v1125_v61  ;;  %v1678_v49 = vpop.eup %1677  ;;  %v807_v54 = vmul.f32 %v1676_v11, %v2764_v17  ;;  %1689 = vrsqrt.f32 %v2823_v7  ;;  %v832_v62 = vand.u32 2147483648, %v2783_v6  ;;  %v1796_v11 = vld [vmem:[%s2052_s11 + $0x158] sm:$0xff] }
 0x159   : > { %1331 = vst [vmem:[%s2312_s8 + $0x128] sm:$0xff] %v1267_v43  ;;  %v816_v36 = vsel %vm815_vm4, %v2762_v23, %v814_v5  ;;  %v1128_v25 = vmul.f32 %v1792_v44, %v1678_v49  ;;  %v2851_v9 = vmul.f32 0.0078125, %v412_v40  ;;  %v2858_v56 = vmul.f32 0.0078125, %v418_v13 }
 0x15a   : > { %v1266_v55 = vadd.f32 %v2774_v47, %v1195_v34  ;;  %v819_v2 = vsel %vm817_vm5, %v818_v21, %v816_v36  ;;  %v1680_v57 = vpop.eup %1679  ;;  %v809_v59 = vsel %vm808_vm6, %v2764_v17, %v807_v54  ;;  %v2861_v15 = vmul.f32 0.0078125, %v416_v48  ;;  %v424_v54 = vpop.xlane.xlu0 %423 }
 0x15b   : > { %v1003_v58 = vadd.f32 1e-08, %v819_v2  ;;  %v1198_v3 = vmul.f32 %v2758_v16, %v1128_v25  ;;  %v812_v23 = vsel %vm810_vm7, %v811_v14, %v809_v59  ;;  %v828_v4 = vmul.f32 %v1680_v57, %v2783_v6  ;;  %v1797_v25 = vld [vmem:[%s2052_s11 + $0x150] sm:$0xff] }
 0x15c   : > { %v1682_v63 = vpop.eup %1681  ;;  %1330 = vst [vmem:[%s2312_s8 + $0x120] sm:$0xff] %v1266_v55  ;;  %v1002_v52 = vadd.f32 1e-08, %v812_v23  ;;  %vm831_vm9 = vcmp.eq.f32.partialorder %v2783_v6, 0.0  ;;  %vm822_vm10 = vcmp.eq.f32.partialorder %v2818_v39, inf  ;;  %vm824_vm11 = vcmp.eq.f32.partialorder %v2818_v39, 0.0 }
 0x15d   : > { %v1127_v10 = vmul.f32 %v1793_v18, %v1682_v63  ;;  %1691 = vrcp.f32 %v1003_v58  ;;  %v1269_v19 = vadd.f32 %v2774_v47, %v1198_v3  ;;  %v830_v0 = vsel %vm829_vm8, %v2783_v6, %v828_v4  ;;  %v430_v63 = vpop.xlane.xlu1 %429 }
 0x15e   : > { %1693 = vrsqrt.f32 %v2851_v9  ;;  %v833_v8 = vsel %vm831_vm9, %v832_v62, %v830_v0  ;;  %v1684_v45 = vpop.eup %1683  ;;  %v825_v50 = vand.u32 2147483648, %v2818_v39  ;;  %vm843_vm12 = vcmp.eq.f32.partialorder %v2823_v7, inf }
 0x15f   : > { %v1197_v17 = vmul.f32 %v2758_v16, %v1127_v10  ;;  %1695 = vrcp.f32 %v1002_v52  ;;  %1333 = vst [vmem:[%s2312_s8 + $0x138] sm:$0xff] %v1269_v19  ;;  %v1005_v28 = vadd.f32 1e-08, %v833_v8  ;;  %v821_v12 = vmul.f32 %v1684_v45, %v2818_v39  ;;  %v1798_v52 = vld [vmem:[%s2052_s11 + $0x168] sm:$0xff] }
 0x160   : > { %1697 = vrsqrt.f32 %v2858_v56  ;;  %v1686_v6 = vpop.eup %1685  ;;  %vm845_vm13 = vcmp.eq.f32.partialorder %v2823_v7, 0.0  ;;  %v846_v33 = vand.u32 2147483648, %v2823_v7  ;;  %vm836_vm14 = vcmp.eq.f32.partialorder %v2851_v9, inf }
 0x161   : > { %v1268_v26 = vadd.f32 %v2774_v47, %v1197_v17  ;;  %1699 = vrsqrt.f32 %v2861_v15  ;;  %v1688_v29 = vpop.eup %1687  ;;  %v1130_v31 = vmul.f32 %v1794_v30, %v1686_v6  ;;  %v823_v46 = vsel %vm822_vm10, %v2818_v39, %v821_v12 }
 0x162   : > { %1701 = vrcp.f32 %v1005_v28  ;;  %v1690_v35 = vpop.eup %1689  ;;  %v1129_v60 = vmul.f32 %v1795_v32, %v1688_v29  ;;  %v2888_v24 = vmul.f32 0.0078125, %v422_v20  ;;  %v826_v40 = vsel %vm824_vm11, %v825_v50, %v823_v46  ;;  %v428_v28 = vpop.xlane.xlu0 %427 }
 0x163   : > { %1332 = vst [vmem:[%s2312_s8 + $0x130] sm:$0xff] %v1268_v26  ;;  %v1200_v38 = vmul.f32 %v2758_v16, %v1130_v31  ;;  %v842_v41 = vmul.f32 %v1690_v35, %v2823_v7  ;;  %v2894_v42 = vmul.f32 0.0078125, %v420_v27  ;;  %v1004_v1 = vadd.f32 1e-08, %v826_v40 }
 0x164   : > { %v1199_v22 = vmul.f32 %v2758_v16, %v1129_v60  ;;  %vm838_vm15 = vcmp.eq.f32.partialorder %v2851_v9, 0.0  ;;  %1703 = vrsqrt.f32 %v2888_v24  ;;  %v839_v61 = vand.u32 2147483648, %v2851_v9  ;;  %v434_v60 = vpop.xlane.xlu1 %433 }
 0x165   : > { %v1271_v37 = vadd.f32 %v2774_v47, %v1200_v38  ;;  %v844_v39 = vsel %vm843_vm12, %v2823_v7, %v842_v41  ;;  %vm857_vm0 = vcmp.eq.f32.partialorder %v2858_v56, inf  ;;  %1705 = vrcp.f32 %v1004_v1 }
 0x166   : > { %v1270_v43 = vadd.f32 %v2774_v47, %v1199_v22  ;;  %v847_v5 = vsel %vm845_vm13, %v846_v33, %v844_v39  ;;  %vm859_vm1 = vcmp.eq.f32.partialorder %v2858_v56, 0.0  ;;  %v860_v36 = vand.u32 2147483648, %v2858_v56  ;;  %v1800_v39 = vld [vmem:[%s2052_s11 + $0x178] sm:$0xff] }
 0x167   : > { %v1692_v53 = vpop.eup %1691  ;;  %1335 = vst [vmem:[%s2312_s8 + $0x148] sm:$0xff] %v1271_v37  ;;  %v1007_v49 = vadd.f32 1e-08, %v847_v5  ;;  %1707 = vrsqrt.f32 %v2894_v42  ;;  %vm850_vm2 = vcmp.eq.f32.partialorder %v2861_v15, inf  ;;  %vm852_vm3 = vcmp.eq.f32.partialorder %v2861_v15, 0.0 }
 0x168   : > { %v1694_v21 = vpop.eup %1693  ;;  %v1132_v34 = vmul.f32 %v1796_v11, %v1692_v53  ;;  %1334 = vst [vmem:[%s2312_s8 + $0x140] sm:$0xff] %v1270_v43  ;;  %v2917_v7 = vmul.f32 0.0078125, %v426_v51  ;;  %v853_v48 = vand.u32 2147483648, %v2861_v15  ;;  %v2927_v62 = vmul.f32 0.0078125, %v424_v54 }
 0x169   : > { %v1696_v14 = vpop.eup %1695  ;;  %v835_v13 = vmul.f32 %v1694_v21, %v2851_v9  ;;  %1709 = vrcp.f32 %v1007_v49  ;;  %vm871_vm4 = vcmp.eq.f32.partialorder %v2888_v24, inf  ;;  %v2946_v45 = vmul.f32 0.0078125, %v430_v63 }
 0x16a   : > { %v1698_v55 = vpop.eup %1697  ;;  %v1202_v44 = vmul.f32 %v2758_v16, %v1132_v34  ;;  %v1131_v2 = vmul.f32 %v1797_v25, %v1696_v14  ;;  %1711 = vrsqrt.f32 %v2917_v7  ;;  %vm873_vm5 = vcmp.eq.f32.partialorder %v2888_v24, 0.0  ;;  %v1801_v25 = vld [vmem:[%s2052_s11 + $0x170] sm:$0xff] }
 0x16b   : > { %v1700_v57 = vpop.eup %1699  ;;  %v837_v58 = vsel %vm836_vm14, %v2851_v9, %v835_v13  ;;  %v856_v59 = vmul.f32 %v1698_v55, %v2858_v56  ;;  %v874_v31 = vand.u32 2147483648, %v2888_v24  ;;  %vm864_vm6 = vcmp.eq.f32.partialorder %v2894_v42, inf }
 0x16c   : > { %v1702_v3 = vpop.eup %1701  ;;  %v1273_v23 = vadd.f32 %v2774_v47, %v1202_v44  ;;  %v1201_v4 = vmul.f32 %v2758_v16, %v1131_v2  ;;  %v840_v18 = vsel %vm838_vm15, %v839_v61, %v837_v58  ;;  %v849_v10 = vmul.f32 %v1700_v57, %v2861_v15 }
 0x16d   : > { %v1134_v19 = vmul.f32 %v1798_v52, %v1702_v3  ;;  %v1006_v0 = vadd.f32 1e-08, %v840_v18  ;;  %v858_v17 = vsel %vm857_vm0, %v2858_v56, %v856_v59  ;;  %vm866_vm7 = vcmp.eq.f32.partialorder %v2894_v42, 0.0  ;;  %v1802_v18 = vld [vmem:[%s2052_s11 + $0x188] sm:$0xff] }
 0x16e   : > { %1337 = vst [vmem:[%s2312_s8 + $0x158] sm:$0xff] %v1273_v23  ;;  %v1272_v8 = vadd.f32 %v2774_v47, %v1201_v4  ;;  %v861_v20 = vsel %vm859_vm1, %v860_v36, %v858_v17  ;;  %v851_v9 = vsel %vm850_vm2, %v2861_v15, %v849_v10  ;;  %v1704_v50 = vpop.eup %1703  ;;  %v1799_v15 = vld [vmem:[%s2052_s11 + $0x160] sm:$0xff]  ;;  %v867_v40 = vand.u32 2147483648, %v2894_v42 }
 0x16f   : > { %v1204_v6 = vmul.f32 %v2758_v16, %v1134_v19  ;;  %1713 = vrcp.f32 %v1006_v0  ;;  %v1009_v26 = vadd.f32 1e-08, %v861_v20  ;;  %v854_v12 = vsel %vm852_vm3, %v853_v48, %v851_v9  ;;  %v1706_v29 = vpop.eup %1705  ;;  %v1803_v19 = vld [vmem:[%s2052_s11 + $0x180] sm:$0xff] }
 0x170   : > { %1336 = vst [vmem:[%s2312_s8 + $0x150] sm:$0xff] %v1272_v8  ;;  %v1008_v27 = vadd.f32 1e-08, %v854_v12  ;;  %v870_v56 = vmul.f32 %v1704_v50, %v2888_v24  ;;  %1715 = vrsqrt.f32 %v2927_v62  ;;  %v1133_v35 = vmul.f32 %v1799_v15, %v1706_v29 }
 0x171   : > { %v1275_v30 = vadd.f32 %v2774_v47, %v1204_v6  ;;  %1717 = vrcp.f32 %v1009_v26  ;;  %v1708_v33 = vpop.eup %1707  ;;  %vm885_vm8 = vcmp.eq.f32.partialorder %v2917_v7, inf  ;;  %v2969_v51 = vmul.f32 0.0078125, %v428_v28 }
 0x172   : > { %1719 = vrcp.f32 %v1008_v27  ;;  %v872_v32 = vsel %vm871_vm4, %v2888_v24, %v870_v56  ;;  %v863_v38 = vmul.f32 %v1708_v33, %v2894_v42  ;;  %v1203_v22 = vmul.f32 %v2758_v16, %v1133_v35  ;;  %v432_v24 = vpop.xlane.xlu0 %431  ;;  %v1804_v33 = vld [vmem:[%s2052_s11 + $0x198] sm:$0xff] }
 0x173   : > { %1339 = vst [vmem:[%s2312_s8 + $0x168] sm:$0xff] %v1275_v30  ;;  %v875_v46 = vsel %vm873_vm5, %v874_v31, %v872_v32  ;;  %1721 = vrsqrt.f32 %v2946_v45  ;;  %v1710_v41 = vpop.eup %1709  ;;  %v888_v43 = vand.u32 2147483648, %v2917_v7  ;;  %v2976_v5 = vmul.f32 0.0078125, %v434_v60 }
 0x174   : > { %v1011_v1 = vadd.f32 1e-08, %v875_v46  ;;  %v1712_v37 = vpop.eup %1711  ;;  %v1136_v61 = vmul.f32 %v1800_v39, %v1710_v41  ;;  %v865_v53 = vsel %vm864_vm6, %v2894_v42, %v863_v38  ;;  %v1274_v21 = vadd.f32 %v2774_v47, %v1203_v22 }
 0x175   : > { %v868_v11 = vsel %vm866_vm7, %v867_v40, %v865_v53  ;;  %v884_v34 = vmul.f32 %v1712_v37, %v2917_v7  ;;  %v2984_v54 = vmul.f32 0.0078125, %v432_v24  ;;  %vm887_vm9 = vcmp.eq.f32.partialorder %v2917_v7, 0.0  ;;  %v1805_v24 = vld [vmem:[%s2052_s11 + $0x190] sm:$0xff] }
 0x176   : > { %1723 = vrcp.f32 %v1011_v1  ;;  %v1206_v49 = vmul.f32 %v2758_v16, %v1136_v61  ;;  %v1010_v36 = vadd.f32 1e-08, %v868_v11  ;;  %1338 = vst [vmem:[%s2312_s8 + $0x160] sm:$0xff] %v1274_v21  ;;  %vm878_vm10 = vcmp.eq.f32.partialorder %v2927_v62, inf  ;;  %v436_v58 = vpop.xlane.xlu0 %435 }
 0x177   : > { %1725 = vrsqrt.f32 %v2969_v51  ;;  %v886_v14 = vsel %vm885_vm8, %v2917_v7, %v884_v34  ;;  %vm880_vm11 = vcmp.eq.f32.partialorder %v2927_v62, 0.0  ;;  %v881_v57 = vand.u32 2147483648, %v2927_v62  ;;  %v438_v7 = vpop.xlane.xlu1 %437 }
 0x178   : > { %1727 = vrsqrt.f32 %v2976_v5  ;;  %v1277_v13 = vadd.f32 %v2774_v47, %v1206_v49  ;;  %v889_v55 = vsel %vm887_vm9, %v888_v43, %v886_v14  ;;  %vm899_vm12 = vcmp.eq.f32.partialorder %v2946_v45, inf }
 0x179   : > { %v1714_v42 = vpop.eup %1713  ;;  %1729 = vrcp.f32 %v1010_v36  ;;  %v1013_v48 = vadd.f32 1e-08, %v889_v55  ;;  %vm901_vm13 = vcmp.eq.f32.partialorder %v2946_v45, 0.0  ;;  %v902_v3 = vand.u32 2147483648, %v2946_v45  ;;  %v1806_v55 = vld [vmem:[%s2052_s11 + $0x1a8] sm:$0xff] }
 0x17a   : > { %v1716_v44 = vpop.eup %1715  ;;  %v1135_v2 = vmul.f32 %v1801_v25, %v1714_v42  ;;  %1341 = vst [vmem:[%s2312_s8 + $0x178] sm:$0xff] %v1277_v13  ;;  %1731 = vrsqrt.f32 %v2984_v54  ;;  %vm892_vm14 = vcmp.eq.f32.partialorder %v2969_v51, inf  ;;  %v3010_v8 = vmul.f32 0.0078125, %v438_v7  ;;  %v440_v40 = vpop.xlane.xlu0 %439 }
 0x17b   : > { %v1718_v59 = vpop.eup %1717  ;;  %v877_v63 = vmul.f32 %v1716_v44, %v2927_v62  ;;  %1733 = vrcp.f32 %v1013_v48  ;;  %v3012_v20 = vmul.f32 0.0078125, %v436_v58  ;;  %vm894_vm15 = vcmp.eq.f32.partialorder %v2969_v51, 0.0  ;;  %v442_v32 = vpop.xlane.xlu1 %441 }
 0x17c   : > { %v1720_v23 = vpop.eup %1719  ;;  %v1205_v4 = vmul.f32 %v2758_v16, %v1135_v2  ;;  %v1138_v10 = vmul.f32 %v1802_v18, %v1718_v59  ;;  %1735 = vrsqrt.f32 %v3010_v8  ;;  %vm913_vm0 = vcmp.eq.f32.partialorder %v2976_v5, inf }
 0x17d   : > { %v1722_v52 = vpop.eup %1721  ;;  %v1137_v0 = vmul.f32 %v1803_v19, %v1720_v23  ;;  %v879_v17 = vsel %vm878_vm10, %v2927_v62, %v877_v63  ;;  %v895_v62 = vand.u32 2147483648, %v2969_v51  ;;  %vm915_vm1 = vcmp.eq.f32.partialorder %v2976_v5, 0.0 }
 0x17e   : > { %v1276_v9 = vadd.f32 %v2774_v47, %v1205_v4  ;;  %v1208_v28 = vmul.f32 %v2758_v16, %v1138_v10  ;;  %v882_v50 = vsel %vm880_vm11, %v881_v57, %v879_v17  ;;  %v898_v6 = vmul.f32 %v1722_v52, %v2946_v45  ;;  %v444_v59 = vpop.xlane.xlu0 %443  ;;  %v1807_v52 = vld [vmem:[%s2052_s11 + $0x1a0] sm:$0xff] }
 0x17f   : > { %v1207_v26 = vmul.f32 %v2758_v16, %v1137_v0  ;;  %v1012_v12 = vadd.f32 1e-08, %v882_v50  ;;  %vm906_vm2 = vcmp.eq.f32.partialorder %v2984_v54, inf  ;;  %v3046_v61 = vmul.f32 0.0078125, %v442_v32 }
 0x180   : > { %v1724_v27 = vpop.eup %1723  ;;  %1340 = vst [vmem:[%s2312_s8 + $0x170] sm:$0xff] %v1276_v9  ;;  %v1279_v56 = vadd.f32 %v2774_v47, %v1208_v28  ;;  %v900_v29 = vsel %vm899_vm12, %v2946_v45, %v898_v6  ;;  %v916_v45 = vand.u32 2147483648, %v2976_v5  ;;  %v3054_v34 = vmul.f32 0.0078125, %v440_v40 }
 0x181   : > { %v1726_v30 = vpop.eup %1725  ;;  %v1278_v31 = vadd.f32 %v2774_v47, %v1207_v26  ;;  %v1140_v15 = vmul.f32 %v1804_v33, %v1724_v27  ;;  %1737 = vrcp.f32 %v1012_v12  ;;  %v903_v35 = vsel %vm901_vm13, %v902_v3, %v900_v29  ;;  %v1808_v27 = vld [vmem:[%s2052_s11 + $0x1b8] sm:$0xff] }
 0x182   : > { %v1728_v60 = vpop.eup %1727  ;;  %1343 = vst [vmem:[%s2312_s8 + $0x188] sm:$0xff] %v1279_v56  ;;  %v1015_v46 = vadd.f32 1e-08, %v903_v35  ;;  %v891_v38 = vmul.f32 %v1726_v30, %v2969_v51  ;;  %1739 = vrsqrt.f32 %v3012_v20  ;;  %v909_v25 = vand.u32 2147483648, %v2984_v54 }
 0x183   : > { %v1730_v41 = vpop.eup %1729  ;;  %1342 = vst [vmem:[%s2312_s8 + $0x180] sm:$0xff] %v1278_v31  ;;  %v1210_v22 = vmul.f32 %v2758_v16, %v1140_v15  ;;  %v912_v1 = vmul.f32 %v1728_v60, %v2976_v5  ;;  %vm908_vm3 = vcmp.eq.f32.partialorder %v2984_v54, 0.0  ;;  %vm927_vm4 = vcmp.eq.f32.partialorder %v3010_v8, inf  ;;  %v1809_v60 = vld [vmem:[%s2052_s11 + $0x1b0] sm:$0xff] }
 0x184   : > { %v1139_v37 = vmul.f32 %v1805_v24, %v1730_v41  ;;  %1741 = vrcp.f32 %v1015_v46  ;;  %v893_v39 = vsel %vm892_vm14, %v2969_v51, %v891_v38  ;;  %v1732_v53 = vpop.eup %1731  ;;  %vm929_vm5 = vcmp.eq.f32.partialorder %v3010_v8, 0.0  ;;  %v1810_v41 = vld [vmem:[%s2052_s11 + $0x1c8] sm:$0xff] }
 0x185   : > { %v1281_v43 = vadd.f32 %v2774_v47, %v1210_v22  ;;  %v896_v21 = vsel %vm894_vm15, %v895_v62, %v893_v39  ;;  %v914_v11 = vsel %vm913_vm0, %v2976_v5, %v912_v1  ;;  %v1734_v49 = vpop.eup %1733  ;;  %v905_v13 = vmul.f32 %v1732_v53, %v2984_v54  ;;  %v446_v5 = vpop.xlane.xlu1 %445 }
 0x186   : > { %v1209_v36 = vmul.f32 %v2758_v16, %v1139_v37  ;;  %v1014_v14 = vadd.f32 1e-08, %v896_v21  ;;  %v917_v42 = vsel %vm915_vm1, %v916_v45, %v914_v11  ;;  %v1142_v51 = vmul.f32 %v1806_v55, %v1734_v49  ;;  %v1736_v57 = vpop.eup %1735  ;;  %v1811_v49 = vld [vmem:[%s2052_s11 + $0x1c0] sm:$0xff] }
 0x187   : > { %1345 = vst [vmem:[%s2312_s8 + $0x198] sm:$0xff] %v1281_v43  ;;  %v1017_v44 = vadd.f32 1e-08, %v917_v42  ;;  %1743 = vrsqrt.f32 %v3046_v61  ;;  %v907_v48 = vsel %vm906_vm2, %v2984_v54, %v905_v13  ;;  %v926_v3 = vmul.f32 %v1736_v57, %v3010_v8 }
 0x188   : > { %v1280_v2 = vadd.f32 %v2774_v47, %v1209_v36  ;;  %1745 = vrcp.f32 %v1014_v14  ;;  %v1212_v7 = vmul.f32 %v2758_v16, %v1142_v51  ;;  %v910_v58 = vsel %vm908_vm3, %v909_v25, %v907_v48 }
 0x189   : > { %1747 = vrcp.f32 %v1017_v44  ;;  %v1016_v63 = vadd.f32 1e-08, %v910_v58  ;;  %v930_v4 = vand.u32 2147483648, %v3010_v8  ;;  %v3077_v18 = vmul.f32 0.0078125, %v446_v5  ;;  %v1812_v58 = vld [vmem:[%s2052_s11 + $0x1d8] sm:$0xff] }
 0x18a   : > { %1344 = vst [vmem:[%s2312_s8 + $0x190] sm:$0xff] %v1280_v2  ;;  %1749 = vrsqrt.f32 %v3054_v34  ;;  %v1283_v54 = vadd.f32 %v2774_v47, %v1212_v7  ;;  %v928_v0 = vsel %vm927_vm4, %v3010_v8, %v926_v3  ;;  %v3081_v17 = vmul.f32 0.0078125, %v444_v59 }
 0x18b   : > { %v1738_v23 = vpop.eup %1737  ;;  %1751 = vrcp.f32 %v1016_v63  ;;  %v931_v9 = vsel %vm929_vm5, %v930_v4, %v928_v0  ;;  %vm920_vm6 = vcmp.eq.f32.partialorder %v3012_v20, inf  ;;  %v923_v12 = vand.u32 2147483648, %v3012_v20 }
 0x18c   : > { %v1740_v10 = vpop.eup %1739  ;;  %v1141_v19 = vmul.f32 %v1807_v52, %v1738_v23  ;;  %1347 = vst [vmem:[%s2312_s8 + $0x1a8] sm:$0xff] %v1283_v54  ;;  %1753 = vrsqrt.f32 %v3077_v18  ;;  %v1019_v26 = vadd.f32 1e-08, %v931_v9  ;;  %vm922_vm7 = vcmp.eq.f32.partialorder %v3012_v20, 0.0 }
 0x18d   : > { %v919_v28 = vmul.f32 %v1740_v10, %v3012_v20  ;;  %1755 = vrsqrt.f32 %v3081_v17  ;;  %vm941_vm8 = vcmp.eq.f32.partialorder %v3046_v61, inf  ;;  %v944_v38 = vand.u32 2147483648, %v3046_v61  ;;  %v1813_v10 = vld [vmem:[%s2052_s11 + $0x1d0] sm:$0xff] }
 0x18e   : > { %v1742_v50 = vpop.eup %1741  ;;  %v1211_v6 = vmul.f32 %v2758_v16, %v1141_v19  ;;  %1757 = vrcp.f32 %v1019_v26  ;;  %vm943_vm9 = vcmp.eq.f32.partialorder %v3046_v61, 0.0  ;;  %vm934_vm10 = vcmp.eq.f32.partialorder %v3054_v34, inf }
 0x18f   : > { %v1144_v56 = vmul.f32 %v1808_v27, %v1742_v50  ;;  %v921_v8 = vsel %vm920_vm6, %v3012_v20, %v919_v28  ;;  %vm936_vm11 = vcmp.eq.f32.partialorder %v3054_v34, 0.0  ;;  %v937_v21 = vand.u32 2147483648, %v3054_v34  ;;  %v1814_v50 = vld [vmem:[%s2052_s11 + $0x1e8] sm:$0xff]  ;;  %v1815_v27 = vld [vmem:[%s2052_s11 + $0x1e0] sm:$0xff] }
 0x190   : > { %v1282_v29 = vadd.f32 %v2774_v47, %v1211_v6  ;;  %v924_v62 = vsel %vm922_vm7, %v923_v12, %v921_v8  ;;  %vm955_vm12 = vcmp.eq.f32.partialorder %v3077_v18, inf  ;;  %vm957_vm13 = vcmp.eq.f32.partialorder %v3077_v18, 0.0 }
 0x191   : > { %v1744_v30 = vpop.eup %1743  ;;  %v1214_v31 = vmul.f32 %v2758_v16, %v1144_v56  ;;  %v1018_v33 = vadd.f32 1e-08, %v924_v62  ;;  %v958_v2 = vand.u32 2147483648, %v3077_v18  ;;  %vm948_vm14 = vcmp.eq.f32.partialorder %v3081_v17, inf }
 0x192   : > { %v1746_v15 = vpop.eup %1745  ;;  %1346 = vst [vmem:[%s2312_s8 + $0x1a0] sm:$0xff] %v1282_v29  ;;  %v940_v35 = vmul.f32 %v1744_v30, %v3046_v61  ;;  %v951_v57 = vand.u32 2147483648, %v3081_v17  ;;  %vm950_vm15 = vcmp.eq.f32.partialorder %v3081_v17, 0.0  ;;  %v1816_v30 = vld [vmem:[%s2052_s11 + $0x1f8] sm:$0xff] }
 0x193   : > { %v1748_v32 = vpop.eup %1747  ;;  %v1285_v20 = vadd.f32 %v2774_v47, %v1214_v31  ;;  %v1143_v46 = vmul.f32 %v1809_v60, %v1746_v15  ;;  %1759 = vrcp.f32 %v1018_v33 }
 0x194   : > { %v1750_v40 = vpop.eup %1749  ;;  %v1146_v22 = vmul.f32 %v1810_v41, %v1748_v32  ;;  %v942_v1 = vsel %vm941_vm8, %v3046_v61, %v940_v35  ;;  %v1817_v32 = vld [vmem:[%s2052_s11 + $0x1f0] sm:$0xff]  ;;  %s1852_s11 = sshll.u32 %s1919_s10, 4  ;;  %s1853_s11 = int_to_ptr.vmem [resolvable:$false] %s1852_s11 }
 0x195   : > { %1349 = vst [vmem:[%s2312_s8 + $0x1b8] sm:$0xff] %v1285_v20  ;;  %v1213_v45 = vmul.f32 %v2758_v16, %v1143_v46  ;;  %v945_v24 = vsel %vm943_vm9, %v944_v38, %v942_v1  ;;  %v933_v37 = vmul.f32 %v1750_v40, %v3054_v34  ;;  %v1752_v39 = vpop.eup %1751  ;;  %s1854_s23 = scalar_lea.vmem %s1853_s11, 16384  ;;  %p1855_p8 = scmp.lt.s32.totalorder %s3158_s27, %s1853_s11 }
 0x196   : > { %v1216_v53 = vmul.f32 %v2758_v16, %v1146_v22  ;;  %v1021_v43 = vadd.f32 1e-08, %v945_v24  ;;  %v1754_v11 = vpop.eup %1753  ;;  %v1145_v36 = vmul.f32 %v1811_v49, %v1752_v39  ;;  %p1856_p10 = scmp.lt.s32.totalorder %s1854_s23, %s1848_s9 }
 0x197   : > { %v1284_v61 = vadd.f32 %v2774_v47, %v1213_v45  ;;  %v935_v14 = vsel %vm934_vm10, %v3054_v34, %v933_v37  ;;  %v954_v55 = vmul.f32 %v1754_v11, %v3077_v18  ;;  %v1756_v51 = vpop.eup %1755 }
 0x198   : > { %v1287_v42 = vadd.f32 %v2774_v47, %v1216_v53  ;;  %1761 = vrcp.f32 %v1021_v43  ;;  %v938_v13 = vsel %vm936_vm11, %v937_v21, %v935_v14  ;;  %v1215_v44 = vmul.f32 %v2758_v16, %v1145_v36  ;;  %v1758_v34 = vpop.eup %1757  ;;  %p1857_p0 = por %p1856_p10, %p1855_p8 }
 0x199   : > { %1348 = vst [vmem:[%s2312_s8 + $0x1b0] sm:$0xff] %v1284_v61  ;;  %v1020_v25 = vadd.f32 1e-08, %v938_v13  ;;  %v956_v48 = vsel %vm955_vm12, %v3077_v18, %v954_v55  ;;  %v947_v5 = vmul.f32 %v1756_v51, %v3081_v17  ;;  %v1148_v59 = vmul.f32 %v1812_v58, %v1758_v34 }
 0x19a   : > { %1351 = vst [vmem:[%s2312_s8 + $0x1c8] sm:$0xff] %v1287_v42  ;;  %v1286_v7 = vadd.f32 %v2774_v47, %v1215_v44  ;;  %v959_v63 = vsel %vm957_vm13, %v958_v2, %v956_v48  ;;  %p1858_p2 = pnand %p1857_p0, %p1851_p13 }
 0x19b   : > { %1763 = vrcp.f32 %v1020_v25  ;;  %v1023_v3 = vadd.f32 1e-08, %v959_v63  ;;  %v949_v23 = vsel %vm948_vm14, %v3081_v17, %v947_v5  ;;  %v1218_v4 = vmul.f32 %v2758_v16, %v1148_v59 }
 0x19c   : > { %1350 = vst [vmem:[%s2312_s8 + $0x1c0] sm:$0xff] %v1286_v7  ;;  %v952_v18 = vsel %vm950_vm15, %v951_v57, %v949_v23 }
 0x19d   : > { %v1760_v54 = vpop.eup %1759  ;;  %1765 = vrcp.f32 %v1023_v3  ;;  %v1022_v19 = vadd.f32 1e-08, %v952_v18  ;;  %v1289_v0 = vadd.f32 %v2774_v47, %v1218_v4 }
 0x19e   : > { %v1147_v52 = vmul.f32 %v1813_v10, %v1760_v54 }
 0x19f   : > { %1767 = vrcp.f32 %v1022_v19  ;;  %1353 = vst [vmem:[%s2312_s8 + $0x1d8] sm:$0xff] %v1289_v0 }
 0x1a0   : > { %v1217_v9 = vmul.f32 %v2758_v16, %v1147_v52 }
 0x1a2   : > { %v1762_v17 = vpop.eup %1761  ;;  %v1288_v28 = vadd.f32 %v2774_v47, %v1217_v9 }
 0x1a3   : > { %v1150_v6 = vmul.f32 %v1814_v50, %v1762_v17 }
 0x1a4   : > { %1352 = vst [vmem:[%s2312_s8 + $0x1d0] sm:$0xff] %v1288_v28 }
 0x1a5   : > { %v1764_v26 = vpop.eup %1763  ;;  %v1220_v12 = vmul.f32 %v2758_v16, %v1150_v6 }
 0x1a6   : > { %v1149_v56 = vmul.f32 %v1815_v27, %v1764_v26 }
 0x1a7   : > { %v1291_v8 = vadd.f32 %v2774_v47, %v1220_v12  ;;  %v1766_v29 = vpop.eup %1765 }
 0x1a8   : > { %v1219_v62 = vmul.f32 %v2758_v16, %v1149_v56  ;;  %v1152_v31 = vmul.f32 %v1816_v30, %v1766_v29 }
 0x1a9   : > { %1355 = vst [vmem:[%s2312_s8 + $0x1e8] sm:$0xff] %v1291_v8  ;;  %v1768_v33 = vpop.eup %1767 }
 0x1aa   : > { %v1290_v15 = vadd.f32 %v2774_v47, %v1219_v62  ;;  %v1222_v35 = vmul.f32 %v2758_v16, %v1152_v31  ;;  %v1151_v20 = vmul.f32 %v1817_v32, %v1768_v33 }
 0x1ac   : > { %1354 = vst [vmem:[%s2312_s8 + $0x1e0] sm:$0xff] %v1290_v15  ;;  %v1293_v60 = vadd.f32 %v2774_v47, %v1222_v35  ;;  %v1221_v46 = vmul.f32 %v2758_v16, %v1151_v20 }
 0x1ae   : > { %1357 = vst [vmem:[%s2312_s8 + $0x1f8] sm:$0xff] %v1293_v60  ;;  %v1292_v38 = vadd.f32 %v2774_v47, %v1221_v46 }
 0x1b0   : > { %1356 = vst [vmem:[%s2312_s8 + $0x1f0] sm:$0xff] %v1292_v38 }
 0x1b1   : > { %1861 = shalt.err (!%p1858_p2)
}
 0x1b2   : > { %s1862_s4 = scalar_lea.hbm %s3156_s30, 8192  ;;  %s1866_s8 = scalar_lea.hbm %s3208_s3, 16384 }
 0x1b3   : > { %p1863_p4 = scmp.ne.s32.totalorder %s3156_s30, %s1862_s4  ;;  %p1867_p9 = scmp.lt.u32.totalorder %s3156_s30, %s3208_s3 }
 0x1b4   : > { %p1868_p1 = scmp.lt.u32.totalorder %s1866_s8, %s1862_s4  ;;  %p1870_p6 = scmp.lt.u32.totalorder %s1862_s4, %s3156_s30 }
 0x1b5   : > { %p1864_p5 = pnand %p1863_p4, %p3215_p11 }
 0x1b6   : > { %p1869_p3 = por %p1868_p1, %p1867_p9 }
 0x1b7   : > { %p1865_p7 = pneg %p1864_p5 }
 0x1b8   : > { %p1871_p12 = por %p1870_p6, %p1869_p3 }
 0x1ba   : > { %p1872_p13 = pnand %p1871_p12, %p1865_p7 }
 0x1bc   : > { %1875 = shalt.err (!%p1872_p13)
}
 0x1bd   : > { %s1920_s20 = smov 128   ;;  %s1921_s22 = smov 8  }
 0x1be   : > { %1465 = dma.vmem_to_hbm [thread:$0]  (%p3215_p11), %s3158_s27, 8192, %s3156_s30, %s1359_s16, %s1920_s20, %s1920_s20, %s1921_s22  }
 0x1bf PF: > { %s1387_s26 = sand.u32 1, %s1902_s12   ;;  %p3216_p8 = scmp.ne.s32.totalorder %s3213_s25, 0 }
 0x1c0   : > { %p3217_p10 = scmp.ge.s32.totalorder %s1914_s15, 2  ;;  %s1388_s28 = scalar_lea.sflag [#allocation4], %s1387_s26 }
 0x1c2   : > { %p1472_p0 = pnand %p3217_p10, %p3216_p8 }
 0x1c4   : > { %1897 = dma.done.wait (!%p1472_p0), %s1388_s28, 8192  }
 0x1c5   : > { %1899 = vsyncadd (!%p1472_p0), %s1388_s28, 4294959104  ;;  %p16_p2 = scmp.ge.s32.totalorder %s1967_s18, 4   ;;  %s3218_s12 = smov %s1906_s13 }
 0x1c6   : > { %s3219_s13 = smov %s1910_s14  ;;  %s3220_s14 = smov %s1979_s21 }
 0x1c7   : > { %s3221_s15 = smov %s1967_s18  ;;  %18 = sbr.rel (!%p16_p2) target bundleno = 5 (0x5), region = 77 }
 0x1ce   :  { %1393 = vsyncpa [#allocation3], 1 }
 0x1cf   :  { %1395 = vsyncpa [#allocation3 + $0x1], 1 }
 0x1d0   :  { %1396 = vsyncpa [#allocation4], 1 }
 0x1d1   :  { %1398 = vsyncpa [#allocation4 + $0x1], 1 }

</bundles_post_ra>
